<compile_context>
chip_gen: v6e
topology: v6e:2x2x1
jax: 0.10.0
libtpu: 0.0.40
codegen_flags: <defaults>
</compile_context>

<pallas_src>
import jax
import jax.numpy as jnp
import numpy as np
from jax.experimental import pallas as pl
from jax.experimental.pallas import tpu as pltpu

LANE = 128  # TPU vreg lane width; every sliced lane dim is padded to this.


def _round_up(x, m):
    return ((x + m - 1) // m) * m


# --------------------------------------------------------------------------- kernel
def make_kgnet_kernel(BP, rnn_layers):
    """BP = padded batch (multiple of 8). All lane dims are padded to LANE=128."""
    TB, QB = 2 * BP, 4 * BP
    FP = HP = LP = LANE
    bf16 = jnp.bfloat16

    def mm(a, w):
        # bf16 MXU operands, f32 accumulation.
        return jnp.dot(a.astype(bf16), w, preferred_element_type=jnp.float32)

    def prelu(v, a):
        return jnp.where(v >= 0, v, a * v)

    def kernel(x2_ref, w1_ref, gru_w_ref, h_in_ref, w2_ref, b2_ref, w3_ref, b3_ref,
               alpha_ref, kg_ref, h_out_ref):
        alpha1 = alpha_ref[0]
        alpha2 = alpha_ref[1]

        # ---- fc_in: fused real/imag ComplexDense (bias folded) + shared PReLU ----
        # x2 rows: [xr (BP) ; xi (BP)]; lane Din carries the constant 1.0 for b1.
        z0 = mm(x2_ref[...], w1_ref[...])                             # (TB, 2*FP)
        z = prelu(jnp.concatenate([z0[:BP, 0:FP], z0[BP:, FP:2 * FP]], axis=0),
                  alpha1)                                             # (TB, FP) = [zr; zi]

        # ---- ComplexGRU (seq_len = 1); branch row order: [rr; ir; ri; ii] ----
        x4 = jnp.concatenate([z, z], axis=0)                          # (QB, FP)
        for l in range(rnn_layers):
            h4 = h_in_ref[l]                                          # (QB, HP), lane 127 == 1.0
            # one matmul per weight set; r/u columns already hold W_ih + W_hh and
            # all biases ride on the hidden constant lane (weight row 2*LANE-1).
            a_r = jnp.concatenate([x4[:TB], h4[:TB]], axis=1)         # (TB, 2*LANE) -> gru_r
            a_i = jnp.concatenate([x4[TB:], h4[TB:]], axis=1)         # (TB, 2*LANE) -> gru_i
            g = jnp.concatenate([mm(a_r, gru_w_ref[2 * l]),
                                 mm(a_i, gru_w_ref[2 * l + 1])], axis=0)  # (QB, 4*HP)
            r = jax.nn.sigmoid(g[:, 0:HP])
            u = jax.nn.sigmoid(g[:, HP:2 * HP])
            n = jnp.tanh(g[:, 2 * HP:3 * HP] + r * g[:, 3 * HP:4 * HP])
            x4 = (1.0 - u) * n + u * h4                               # new hidden, f32
            h_out_ref[l] = x4
        # TODO(synk): in long streaming use the bf16 cast of the hidden state inside
        # `mm` slowly accumulates quantization error; keep the hidden contraction in
        # f32 if drift across many time steps matters.

        # complex combine: y = (Frr - Fii) + j (Fri + Fir)
        yr = x4[0:BP] - x4[3 * BP:4 * BP]
        yi = x4[2 * BP:3 * BP] + x4[BP:2 * BP]
        y2 = jnp.concatenate([yr, yi], axis=0)                        # (TB, HP)

        # ---- fc_out: Dense -> shared PReLU -> Dense (real/imag fused) ----
        o2 = mm(y2, w2_ref[...])                                      # (TB, 2*FP)
        a2 = prelu(jnp.concatenate([o2[:BP, 0:FP], o2[BP:, FP:2 * FP]], axis=0)
                   + b2_ref[...], alpha2)                             # (TB, FP)
        o3 = mm(a2, w3_ref[...])                                      # (TB, 2*LP)
        kg_ref[...] = (jnp.concatenate([o3[:BP, 0:LP], o3[BP:, LP:2 * LP]], axis=0)
                       + b3_ref[...])                                 # (TB, LP) = [kg_r; kg_i]

    return kernel


# --------------------------------------------------------------------------- params
def init_params(key, L, fc_dim, rnn_layers, rnn_dim):
    Din = 2 * L + 1
    keys = iter(jax.random.split(key, 64))

    def lin(o, i):
        w = jax.random.normal(next(keys), (o, i), jnp.float32) * 0.1
        b = jax.random.normal(next(keys), (o,), jnp.float32) * 0.1
        return w, b

    p = {}
    p["w1r"], p["b1r"] = lin(fc_dim, Din)
    p["w1i"], p["b1i"] = lin(fc_dim, Din)
    p["alpha1"] = jnp.array([0.25], jnp.float32)          # PReLU default init
    for name in ("gru_r", "gru_i"):
        layers = []
        for l in range(rnn_layers):
            in_l = fc_dim if l == 0 else rnn_dim
            wih = jax.random.normal(next(keys), (3 * rnn_dim, in_l), jnp.float32) * 0.1
            whh = jax.random.normal(next(keys), (3 * rnn_dim, rnn_dim), jnp.float32) * 0.1
            bih = jax.random.normal(next(keys), (3 * rnn_dim,), jnp.float32) * 0.1
            bhh = jax.random.normal(next(keys), (3 * rnn_dim,), jnp.float32) * 0.1
            layers.append((wih, whh, bih, bhh))
        p[name] = layers
    p["w2r"], p["b2r"] = lin(fc_dim, rnn_dim)
    p["w2i"], p["b2i"] = lin(fc_dim, rnn_dim)
    p["alpha2"] = jnp.array([0.25], jnp.float32)
    p["w3r"], p["b3r"] = lin(L, fc_dim)
    p["w3i"], p["b3i"] = lin(L, fc_dim)
    return p


def pack_params(params, L, fc_dim, rnn_layers, rnn_dim, B):
    """One-time host-side packing: 128-lane padding, gate merge, bias folding, bf16."""
    Din = 2 * L + 1
    F, H = fc_dim, rnn_dim
    assert Din + 1 <= LANE and F <= LANE and H < LANE and L <= LANE
    BP = max(8, _round_up(B, 8))
    TB = 2 * BP
    f32 = np.float32

    def A(x):
        return np.asarray(x, f32)

    # fc_in: [w1r.T | w1i.T]; b1r/b1i in row Din (matched by the 1.0 lane of x2).
    w1 = np.zeros((LANE, 2 * LANE), f32)
    w1[:Din, 0:F] = A(params["w1r"]).T
    w1[Din, 0:F] = A(params["b1r"])
    w1[:Din, LANE:LANE + F] = A(params["w1i"]).T
    w1[Din, LANE:LANE + F] = A(params["b1i"])

    # GRU: per (layer, weight set) one (2*LANE, 4*LANE) block.
    #   rows [0:LANE)      = x side (W_ih), rows [LANE:2*LANE) = h side (W_hh)
    #   cols [r | u | gi_n | gh_n], 128 lanes each; r/u columns shared by ih & hh;
    #   all biases live in row 2*LANE-1 (multiplied by the hidden constant lane 127).
    gru_w = np.zeros((rnn_layers * 2, 2 * LANE, 4 * LANE), f32)
    for l in range(rnn_layers):
        in_l = F if l == 0 else H
        for s, name in enumerate(("gru_r", "gru_i")):
            wih, whh, bih, bhh = (A(t) for t in params[name][l])
            W = gru_w[2 * l + s]
            # x side
            W[:in_l, 0:H] = wih[0:H].T                                  # reset
            W[:in_l, LANE:LANE + H] = wih[H:2 * H].T                    # update
            W[:in_l, 2 * LANE:2 * LANE + H] = wih[2 * H:3 * H].T        # gi_n
            # h side
            W[LANE:LANE + H, 0:H] = whh[0:H].T
            W[LANE:LANE + H, LANE:LANE + H] = whh[H:2 * H].T
            W[LANE:LANE + H, 3 * LANE:3 * LANE + H] = whh[2 * H:3 * H].T  # gh_n
            # folded biases
            brow = 2 * LANE - 1
            W[brow, 0:H] = bih[0:H] + bhh[0:H]
            W[brow, LANE:LANE + H] = bih[H:2 * H] + bhh[H:2 * H]
            W[brow, 2 * LANE:2 * LANE + H] = bih[2 * H:3 * H]
            W[brow, 3 * LANE:3 * LANE + H] = bhh[2 * H:3 * H]

    # fc_out dense1 / dense2 (biases kept as small explicit adds).
    w2 = np.zeros((LANE, 2 * LANE), f32)
    w2[:H, 0:F] = A(params["w2r"]).T
    w2[:H, LANE:LANE + F] = A(params["w2i"]).T
    w3 = np.zeros((LANE, 2 * LANE), f32)
    w3[:F, 0:L] = A(params["w3r"]).T
    w3[:F, LANE:LANE + L] = A(params["w3i"]).T

    b2 = np.zeros((TB, LANE), f32)
    b2[:BP, 0:F] = A(params["b2r"])[None, :]
    b2[BP:, 0:F] = A(params["b2i"])[None, :]
    b3 = np.zeros((TB, LANE), f32)
    b3[:BP, 0:L] = A(params["b3r"])[None, :]
    b3[BP:, 0:L] = A(params["b3i"])[None, :]

    alphas = np.array([float(params["alpha1"][0]), float(params["alpha2"][0])], f32)

    return {
        "BP": BP, "Din": Din,
        "w1": jnp.asarray(w1, jnp.bfloat16),
        "gru_w": jnp.asarray(gru_w, jnp.bfloat16),
        "w2": jnp.asarray(w2, jnp.bfloat16),
        "w3": jnp.asarray(w3, jnp.bfloat16),
        "b2": jnp.asarray(b2, jnp.float32),
        "b3": jnp.asarray(b3, jnp.float32),
        "alphas": jnp.asarray(alphas, jnp.float32),
    }


# --------------------------------------------------------------------------- wrapper
def kgnet_forward(packed, xr, xi, h_rr, h_ir, h_ri, h_ii, L, fc_dim, rnn_layers, rnn_dim):
    B = xr.shape[0]
    H = rnn_dim
    BP, Din = packed["BP"], packed["Din"]
    TB, QB = 2 * BP, 4 * BP

    # ---- host/XLA-side padding (no in-kernel pads/concats of inputs) ----
    # x2 rows [xr ; xi], batch padded to BP, lanes padded to 128, lane Din := 1.0
    x2 = jnp.zeros((TB, LANE), jnp.float32)
    x2 = x2.at[:B, :Din].set(xr).at[BP:BP + B, :Din].set(xi)
    x2 = x2.at[:, Din].set(1.0)

    # hidden states packed as (layers, 4*BP, 128), branch rows [rr; ir; ri; ii];
    # lane 127 := 1.0 is the constant that the folded GRU biases multiply.
    h_in = jnp.zeros((rnn_layers, QB, LANE), jnp.float32)
    h_in = (h_in.at[:, 0 * BP:0 * BP + B, :H].set(h_rr)
                 .at[:, 1 * BP:1 * BP + B, :H].set(h_ir)
                 .at[:, 2 * BP:2 * BP + B, :H].set(h_ri)
                 .at[:, 3 * BP:3 * BP + B, :H].set(h_ii))
    h_in = h_in.at[:, :, LANE - 1].set(1.0)

    vspec = pl.BlockSpec(memory_space=pltpu.MemorySpace.VMEM)
    sspec = pl.BlockSpec(memory_space=pltpu.MemorySpace.SMEM)

    out_shapes = (
        jax.ShapeDtypeStruct((TB, LANE), jnp.float32),               # [kg_r ; kg_i], lane-dense
        jax.ShapeDtypeStruct((rnn_layers, QB, LANE), jnp.float32),   # new hidden, lane-dense
    )
    kernel = make_kgnet_kernel(BP, rnn_layers)

    # TODO(synk): for streaming use (many time steps) wrap this in a grid=(T,) call
    # with constant-index weight BlockSpecs so the packed weights stay VMEM-resident
    # instead of being re-DMA'd per step; and add a "parallel" batch grid axis once
    # B is production-sized so v7x's two TensorCores are both used.
    kg, h_out = pl.pallas_call(
        kernel,
        out_shape=out_shapes,
        in_specs=[vspec] * 8 + [sspec],
        out_specs=(vspec, vspec),
    )(x2, packed["w1"], packed["gru_w"], h_in,
      packed["w2"], packed["b2"], packed["w3"], packed["b3"], packed["alphas"])

    # torch: fc_out(rnn_out) is (B, 1, L); .permute(0, 2, 1) -> (B, L, 1)
    kg_r = kg[:B, :L].reshape(B, L, 1)
    kg_i = kg[BP:BP + B, :L].reshape(B, L, 1)
    nh_rr = h_out[:, 0 * BP:0 * BP + B, :H]
    nh_ir = h_out[:, 1 * BP:1 * BP + B, :H]
    nh_ri = h_out[:, 2 * BP:2 * BP + B, :H]
    nh_ii = h_out[:, 3 * BP:3 * BP + B, :H]
    return kg_r, kg_i, nh_rr, nh_ir, nh_ri, nh_ii


# --------------------------------------------------------------------------- reference
def reference_forward(params, xr, xi, h_rr, h_ir, h_ri, h_ii, L, rnn_layers, rnn_dim):
    hp = jax.lax.Precision.HIGHEST

    def dense(x, w, b):
        return jnp.dot(x, w.T, precision=hp) + b

    def prelu(x, a):
        return jnp.where(x >= 0, x, a * x)

    def gru(weights, x, h):
        cur = x
        hs = []
        H = rnn_dim
        for l, (wih, whh, bih, bhh) in enumerate(weights):
            gi = jnp.dot(cur, wih.T, precision=hp) + bih
            gh = jnp.dot(h[l], whh.T, precision=hp) + bhh
            r = jax.nn.sigmoid(gi[:, :H] + gh[:, :H])
            z = jax.nn.sigmoid(gi[:, H:2 * H] + gh[:, H:2 * H])
            n = jnp.tanh(gi[:, 2 * H:] + r * gh[:, 2 * H:])
            cur = (1.0 - z) * n + z * h[l]
            hs.append(cur)
        return cur, jnp.stack(hs)

    a1 = params["alpha1"][0]
    a2 = params["alpha2"][0]
    zr = prelu(dense(xr, params["w1r"], params["b1r"]), a1)
    zi = prelu(dense(xi, params["w1i"], params["b1i"]), a1)
    Frr, nh_rr = gru(params["gru_r"], zr, h_rr)
    Fir, nh_ir = gru(params["gru_r"], zi, h_ir)
    Fri, nh_ri = gru(params["gru_i"], zr, h_ri)
    Fii, nh_ii = gru(params["gru_i"], zi, h_ii)
    yr = Frr - Fii
    yi = Fri + Fir
    ar = prelu(dense(yr, params["w2r"], params["b2r"]), a2)
    ai = prelu(dense(yi, params["w2i"], params["b2i"]), a2)
    kr = dense(ar, params["w3r"], params["b3r"])
    ki = dense(ai, params["w3i"], params["b3i"])
    return kr.reshape(-1, L, 1), ki.reshape(-1, L, 1), nh_rr, nh_ir, nh_ri, nh_ii


# --------------------------------------------------------------------------- main
if __name__ == "__main__":
    L, fc_dim, rnn_layers, rnn_dim = 8, 32, 2, 32
    B = 2

    key = jax.random.PRNGKey(0)
    kp, kxr, kxi, kh = jax.random.split(key, 4)
    params = init_params(kp, L, fc_dim, rnn_layers, rnn_dim)
    packed = pack_params(params, L, fc_dim, rnn_layers, rnn_dim, B)   # one-time prepack

    # input_feature is complex (B, 2L+1); carried as a real/imag float32 pair.
    xr = jax.random.normal(kxr, (B, 2 * L + 1), jnp.float32)
    xi = jax.random.normal(kxi, (B, 2 * L + 1), jnp.float32)
    # non-zero recurrent state (as after a few streaming steps) to exercise the h path
    hs = jax.random.normal(kh, (4, rnn_layers, B, rnn_dim), jnp.float32) * 0.3
    h_rr, h_ir, h_ri, h_ii = hs[0], hs[1], hs[2], hs[3]

    out = kgnet_forward(packed, xr, xi, h_rr, h_ir, h_ri, h_ii,
                        L, fc_dim, rnn_layers, rnn_dim)
    out = jax.block_until_ready(out)

    ref = reference_forward(params, xr, xi, h_rr, h_ir, h_ri, h_ii, L, rnn_layers, rnn_dim)

    # bf16 MXU operands (f32 accumulation) -> slightly looser tolerance than pure f32.
    tol = dict(rtol=2e-2, atol=2e-2)
    for got, want in zip(out, ref):
        np.testing.assert_allclose(np.asarray(got), np.asarray(want), **tol)

    print("KERNEL_OK")
</pallas_src>

<mosaic_0001>
module attributes {stable_mosaic.version = 11 : i64} {
  func.func @kernel(%arg0: memref<16x128xf32, #tpu.memory_space<vmem>>, %arg1: memref<128x256xbf16, #tpu.memory_space<vmem>>, %arg2: memref<4x256x512xbf16, #tpu.memory_space<vmem>>, %arg3: memref<2x32x128xf32, #tpu.memory_space<vmem>>, %arg4: memref<128x256xbf16, #tpu.memory_space<vmem>>, %arg5: memref<16x128xf32, #tpu.memory_space<vmem>>, %arg6: memref<128x256xbf16, #tpu.memory_space<vmem>>, %arg7: memref<16x128xf32, #tpu.memory_space<vmem>>, %arg8: memref<2xf32, #tpu.memory_space<smem>>, %arg9: memref<16x128xf32, #tpu.memory_space<vmem>>, %arg10: memref<2x32x128xf32, #tpu.memory_space<vmem>>) attributes {dimension_semantics = [], scalar_prefetch = 0 : i64, scratch_operands = 0 : i64, tpu.core_type = #tpu.core_type<tc>} {
    %c0 = arith.constant 0 : index
    %0 = memref.load %arg8[%c0] : memref<2xf32, #tpu.memory_space<smem>>
    %c1 = arith.constant 1 : index
    %1 = memref.load %arg8[%c1] : memref<2xf32, #tpu.memory_space<smem>>
    %c0_0 = arith.constant 0 : index
    %c0_1 = arith.constant 0 : index
    %2 = vector.load %arg0[%c0_0, %c0_1] : memref<16x128xf32, #tpu.memory_space<vmem>>, vector<16x128xf32>
    %c0_2 = arith.constant 0 : index
    %c0_3 = arith.constant 0 : index
    %3 = vector.load %arg1[%c0_2, %c0_3] : memref<128x256xbf16, #tpu.memory_space<vmem>>, vector<128x256xbf16>
    %4 = arith.truncf %2 : vector<16x128xf32> to vector<16x128xbf16>
    %cst = arith.constant dense<0.000000e+00> : vector<16x256xf32>
    %5 = tpu.matmul %4, %3, %cst {dimension_numbers = #tpu.dot_dimension_numbers<[1], [0], [0], [1], [0, 0, 1, 1], [], []>} : vector<16x128xbf16>, vector<128x256xbf16>, vector<16x256xf32> -> vector<16x256xf32>
    %6 = vector.extract_strided_slice %5 {offsets = [0, 0], sizes = [8, 128], strides = [1, 1]} : vector<16x256xf32> to vector<8x128xf32>
    %7 = vector.extract_strided_slice %5 {offsets = [8, 128], sizes = [8, 128], strides = [1, 1]} : vector<16x256xf32> to vector<8x128xf32>
    %8 = tpu.concatenate %6, %7 in 0 : vector<8x128xf32>, vector<8x128xf32> -> vector<16x128xf32>
    %cst_4 = arith.constant 0.000000e+00 : f32
    %9 = vector.broadcast %cst_4 : f32 to vector<16x128xf32>
    %10 = arith.cmpf oge, %8, %9 : vector<16x128xf32>
    %11 = vector.broadcast %0 : f32 to vector<16x128xf32>
    %12 = arith.mulf %11, %8 : vector<16x128xf32>
    %13 = arith.select %10, %8, %12 : vector<16x128xi1>, vector<16x128xf32>
    %14 = tpu.concatenate %13, %13 in 0 : vector<16x128xf32>, vector<16x128xf32> -> vector<32x128xf32>
    %c0_5 = arith.constant 0 : index
    %c0_6 = arith.constant 0 : index
    %c0_7 = arith.constant 0 : index
    %15 = vector.load %arg3[%c0_5, %c0_6, %c0_7] : memref<2x32x128xf32, #tpu.memory_space<vmem>>, vector<1x32x128xf32>
    %16 = vector.shape_cast %15 : vector<1x32x128xf32> to vector<32x128xf32>
    %17 = vector.extract_strided_slice %14 {offsets = [0, 0], sizes = [16, 128], strides = [1, 1]} : vector<32x128xf32> to vector<16x128xf32>
    %18 = vector.extract_strided_slice %16 {offsets = [0, 0], sizes = [16, 128], strides = [1, 1]} : vector<32x128xf32> to vector<16x128xf32>
    %19 = tpu.concatenate %17, %18 in 1 : vector<16x128xf32>, vector<16x128xf32> -> vector<16x256xf32>
    %20 = vector.extract_strided_slice %14 {offsets = [16, 0], sizes = [16, 128], strides = [1, 1]} : vector<32x128xf32> to vector<16x128xf32>
    %21 = vector.extract_strided_slice %16 {offsets = [16, 0], sizes = [16, 128], strides = [1, 1]} : vector<32x128xf32> to vector<16x128xf32>
    %22 = tpu.concatenate %20, %21 in 1 : vector<16x128xf32>, vector<16x128xf32> -> vector<16x256xf32>
    %c0_8 = arith.constant 0 : index
    %c0_9 = arith.constant 0 : index
    %c0_10 = arith.constant 0 : index
    %23 = vector.load %arg2[%c0_8, %c0_9, %c0_10] : memref<4x256x512xbf16, #tpu.memory_space<vmem>>, vector<1x256x512xbf16>
    %24 = vector.shape_cast %23 : vector<1x256x512xbf16> to vector<256x512xbf16>
    %25 = arith.truncf %19 : vector<16x256xf32> to vector<16x256xbf16>
    %cst_11 = arith.constant dense<0.000000e+00> : vector<16x512xf32>
    %26 = tpu.matmul %25, %24, %cst_11 {dimension_numbers = #tpu.dot_dimension_numbers<[1], [0], [0], [1], [0, 0, 1, 1], [], []>} : vector<16x256xbf16>, vector<256x512xbf16>, vector<16x512xf32> -> vector<16x512xf32>
    %c1_12 = arith.constant 1 : index
    %c0_13 = arith.constant 0 : index
    %c0_14 = arith.constant 0 : index
    %27 = vector.load %arg2[%c1_12, %c0_13, %c0_14] : memref<4x256x512xbf16, #tpu.memory_space<vmem>>, vector<1x256x512xbf16>
    %28 = vector.shape_cast %27 : vector<1x256x512xbf16> to vector<256x512xbf16>
    %29 = arith.truncf %22 : vector<16x256xf32> to vector<16x256xbf16>
    %cst_15 = arith.constant dense<0.000000e+00> : vector<16x512xf32>
    %30 = tpu.matmul %29, %28, %cst_15 {dimension_numbers = #tpu.dot_dimension_numbers<[1], [0], [0], [1], [0, 0, 1, 1], [], []>} : vector<16x256xbf16>, vector<256x512xbf16>, vector<16x512xf32> -> vector<16x512xf32>
    %31 = tpu.concatenate %26, %30 in 0 : vector<16x512xf32>, vector<16x512xf32> -> vector<32x512xf32>
    %32 = vector.extract_strided_slice %31 {offsets = [0, 0], sizes = [32, 128], strides = [1, 1]} : vector<32x512xf32> to vector<32x128xf32>
    %33 = arith.negf %32 : vector<32x128xf32>
    %34 = math.exp %33 : vector<32x128xf32>
    %cst_16 = arith.constant 1.000000e+00 : f32
    %35 = vector.broadcast %cst_16 : f32 to vector<32x128xf32>
    %36 = arith.addf %35, %34 : vector<32x128xf32>
    %37 = arith.divf %35, %36 : vector<32x128xf32>
    %38 = vector.extract_strided_slice %31 {offsets = [0, 128], sizes = [32, 128], strides = [1, 1]} : vector<32x512xf32> to vector<32x128xf32>
    %39 = arith.negf %38 : vector<32x128xf32>
    %40 = math.exp %39 : vector<32x128xf32>
    %cst_17 = arith.constant 1.000000e+00 : f32
    %41 = vector.broadcast %cst_17 : f32 to vector<32x128xf32>
    %42 = arith.addf %41, %40 : vector<32x128xf32>
    %43 = arith.divf %41, %42 : vector<32x128xf32>
    %44 = vector.extract_strided_slice %31 {offsets = [0, 256], sizes = [32, 128], strides = [1, 1]} : vector<32x512xf32> to vector<32x128xf32>
    %45 = vector.extract_strided_slice %31 {offsets = [0, 384], sizes = [32, 128], strides = [1, 1]} : vector<32x512xf32> to vector<32x128xf32>
    %46 = arith.mulf %37, %45 : vector<32x128xf32>
    %47 = arith.addf %44, %46 : vector<32x128xf32>
    %48 = math.tanh %47 : vector<32x128xf32>
    %cst_18 = arith.constant 1.000000e+00 : f32
    %49 = vector.broadcast %cst_18 : f32 to vector<32x128xf32>
    %50 = arith.subf %49, %43 : vector<32x128xf32>
    %51 = arith.mulf %50, %48 : vector<32x128xf32>
    %52 = arith.mulf %43, %16 : vector<32x128xf32>
    %53 = arith.addf %51, %52 : vector<32x128xf32>
    %c0_19 = arith.constant 0 : index
    %c0_20 = arith.constant 0 : index
    %c0_21 = arith.constant 0 : index
    %54 = vector.load %arg10[%c0_19, %c0_20, %c0_21] : memref<2x32x128xf32, #tpu.memory_space<vmem>>, vector<1x32x128xf32>
    %55 = vector.shape_cast %54 : vector<1x32x128xf32> to vector<32x128xf32>
    %56 = vector.shape_cast %53 : vector<32x128xf32> to vector<1x32x128xf32>
    tpu.vector_store %arg10[%c0_19, %c0_20, %c0_21], %56 {strides = array<i32>} : memref<2x32x128xf32, #tpu.memory_space<vmem>>, vector<1x32x128xf32>,
    %c1_22 = arith.constant 1 : index
    %c0_23 = arith.constant 0 : index
    %c0_24 = arith.constant 0 : index
    %57 = vector.load %arg3[%c1_22, %c0_23, %c0_24] : memref<2x32x128xf32, #tpu.memory_space<vmem>>, vector<1x32x128xf32>
    %58 = vector.shape_cast %57 : vector<1x32x128xf32> to vector<32x128xf32>
    %59 = vector.extract_strided_slice %53 {offsets = [0, 0], sizes = [16, 128], strides = [1, 1]} : vector<32x128xf32> to vector<16x128xf32>
    %60 = vector.extract_strided_slice %58 {offsets = [0, 0], sizes = [16, 128], strides = [1, 1]} : vector<32x128xf32> to vector<16x128xf32>
    %61 = tpu.concatenate %59, %60 in 1 : vector<16x128xf32>, vector<16x128xf32> -> vector<16x256xf32>
    %62 = vector.extract_strided_slice %53 {offsets = [16, 0], sizes = [16, 128], strides = [1, 1]} : vector<32x128xf32> to vector<16x128xf32>
    %63 = vector.extract_strided_slice %58 {offsets = [16, 0], sizes = [16, 128], strides = [1, 1]} : vector<32x128xf32> to vector<16x128xf32>
    %64 = tpu.concatenate %62, %63 in 1 : vector<16x128xf32>, vector<16x128xf32> -> vector<16x256xf32>
    %c2 = arith.constant 2 : index
    %c0_25 = arith.constant 0 : index
    %c0_26 = arith.constant 0 : index
    %65 = vector.load %arg2[%c2, %c0_25, %c0_26] : memref<4x256x512xbf16, #tpu.memory_space<vmem>>, vector<1x256x512xbf16>
    %66 = vector.shape_cast %65 : vector<1x256x512xbf16> to vector<256x512xbf16>
    %67 = arith.truncf %61 : vector<16x256xf32> to vector<16x256xbf16>
    %cst_27 = arith.constant dense<0.000000e+00> : vector<16x512xf32>
    %68 = tpu.matmul %67, %66, %cst_27 {dimension_numbers = #tpu.dot_dimension_numbers<[1], [0], [0], [1], [0, 0, 1, 1], [], []>} : vector<16x256xbf16>, vector<256x512xbf16>, vector<16x512xf32> -> vector<16x512xf32>
    %c3 = arith.constant 3 : index
    %c0_28 = arith.constant 0 : index
    %c0_29 = arith.constant 0 : index
    %69 = vector.load %arg2[%c3, %c0_28, %c0_29] : memref<4x256x512xbf16, #tpu.memory_space<vmem>>, vector<1x256x512xbf16>
    %70 = vector.shape_cast %69 : vector<1x256x512xbf16> to vector<256x512xbf16>
    %71 = arith.truncf %64 : vector<16x256xf32> to vector<16x256xbf16>
    %cst_30 = arith.constant dense<0.000000e+00> : vector<16x512xf32>
    %72 = tpu.matmul %71, %70, %cst_30 {dimension_numbers = #tpu.dot_dimension_numbers<[1], [0], [0], [1], [0, 0, 1, 1], [], []>} : vector<16x256xbf16>, vector<256x512xbf16>, vector<16x512xf32> -> vector<16x512xf32>
    %73 = tpu.concatenate %68, %72 in 0 : vector<16x512xf32>, vector<16x512xf32> -> vector<32x512xf32>
    %74 = vector.extract_strided_slice %73 {offsets = [0, 0], sizes = [32, 128], strides = [1, 1]} : vector<32x512xf32> to vector<32x128xf32>
    %75 = arith.negf %74 : vector<32x128xf32>
    %76 = math.exp %75 : vector<32x128xf32>
    %cst_31 = arith.constant 1.000000e+00 : f32
    %77 = vector.broadcast %cst_31 : f32 to vector<32x128xf32>
    %78 = arith.addf %77, %76 : vector<32x128xf32>
    %79 = arith.divf %77, %78 : vector<32x128xf32>
    %80 = vector.extract_strided_slice %73 {offsets = [0, 128], sizes = [32, 128], strides = [1, 1]} : vector<32x512xf32> to vector<32x128xf32>
    %81 = arith.negf %80 : vector<32x128xf32>
    %82 = math.exp %81 : vector<32x128xf32>
    %cst_32 = arith.constant 1.000000e+00 : f32
    %83 = vector.broadcast %cst_32 : f32 to vector<32x128xf32>
    %84 = arith.addf %83, %82 : vector<32x128xf32>
    %85 = arith.divf %83, %84 : vector<32x128xf32>
    %86 = vector.extract_strided_slice %73 {offsets = [0, 256], sizes = [32, 128], strides = [1, 1]} : vector<32x512xf32> to vector<32x128xf32>
    %87 = vector.extract_strided_slice %73 {offsets = [0, 384], sizes = [32, 128], strides = [1, 1]} : vector<32x512xf32> to vector<32x128xf32>
    %88 = arith.mulf %79, %87 : vector<32x128xf32>
    %89 = arith.addf %86, %88 : vector<32x128xf32>
    %90 = math.tanh %89 : vector<32x128xf32>
    %cst_33 = arith.constant 1.000000e+00 : f32
    %91 = vector.broadcast %cst_33 : f32 to vector<32x128xf32>
    %92 = arith.subf %91, %85 : vector<32x128xf32>
    %93 = arith.mulf %92, %90 : vector<32x128xf32>
    %94 = arith.mulf %85, %58 : vector<32x128xf32>
    %95 = arith.addf %93, %94 : vector<32x128xf32>
    %c1_34 = arith.constant 1 : index
    %c0_35 = arith.constant 0 : index
    %c0_36 = arith.constant 0 : index
    %96 = vector.load %arg10[%c1_34, %c0_35, %c0_36] : memref<2x32x128xf32, #tpu.memory_space<vmem>>, vector<1x32x128xf32>
    %97 = vector.shape_cast %96 : vector<1x32x128xf32> to vector<32x128xf32>
    %98 = vector.shape_cast %95 : vector<32x128xf32> to vector<1x32x128xf32>
    tpu.vector_store %arg10[%c1_34, %c0_35, %c0_36], %98 {strides = array<i32>} : memref<2x32x128xf32, #tpu.memory_space<vmem>>, vector<1x32x128xf32>,
    %99 = vector.extract_strided_slice %95 {offsets = [0, 0], sizes = [8, 128], strides = [1, 1]} : vector<32x128xf32> to vector<8x128xf32>
    %100 = vector.extract_strided_slice %95 {offsets = [24, 0], sizes = [8, 128], strides = [1, 1]} : vector<32x128xf32> to vector<8x128xf32>
    %101 = arith.subf %99, %100 : vector<8x128xf32>
    %102 = vector.extract_strided_slice %95 {offsets = [16, 0], sizes = [8, 128], strides = [1, 1]} : vector<32x128xf32> to vector<8x128xf32>
    %103 = vector.extract_strided_slice %95 {offsets = [8, 0], sizes = [8, 128], strides = [1, 1]} : vector<32x128xf32> to vector<8x128xf32>
    %104 = arith.addf %102, %103 : vector<8x128xf32>
    %105 = tpu.concatenate %101, %104 in 0 : vector<8x128xf32>, vector<8x128xf32> -> vector<16x128xf32>
    %c0_37 = arith.constant 0 : index
    %c0_38 = arith.constant 0 : index
    %106 = vector.load %arg4[%c0_37, %c0_38] : memref<128x256xbf16, #tpu.memory_space<vmem>>, vector<128x256xbf16>
    %107 = arith.truncf %105 : vector<16x128xf32> to vector<16x128xbf16>
    %cst_39 = arith.constant dense<0.000000e+00> : vector<16x256xf32>
    %108 = tpu.matmul %107, %106, %cst_39 {dimension_numbers = #tpu.dot_dimension_numbers<[1], [0], [0], [1], [0, 0, 1, 1], [], []>} : vector<16x128xbf16>, vector<128x256xbf16>, vector<16x256xf32> -> vector<16x256xf32>
    %109 = vector.extract_strided_slice %108 {offsets = [0, 0], sizes = [8, 128], strides = [1, 1]} : vector<16x256xf32> to vector<8x128xf32>
    %110 = vector.extract_strided_slice %108 {offsets = [8, 128], sizes = [8, 128], strides = [1, 1]} : vector<16x256xf32> to vector<8x128xf32>
    %111 = tpu.concatenate %109, %110 in 0 : vector<8x128xf32>, vector<8x128xf32> -> vector<16x128xf32>
    %c0_40 = arith.constant 0 : index
    %c0_41 = arith.constant 0 : index
    %112 = vector.load %arg5[%c0_40, %c0_41] : memref<16x128xf32, #tpu.memory_space<vmem>>, vector<16x128xf32>
    %113 = arith.addf %111, %112 : vector<16x128xf32>
    %cst_42 = arith.constant 0.000000e+00 : f32
    %114 = vector.broadcast %cst_42 : f32 to vector<16x128xf32>
    %115 = arith.cmpf oge, %113, %114 : vector<16x128xf32>
    %116 = vector.broadcast %1 : f32 to vector<16x128xf32>
    %117 = arith.mulf %116, %113 : vector<16x128xf32>
    %118 = arith.select %115, %113, %117 : vector<16x128xi1>, vector<16x128xf32>
    %c0_43 = arith.constant 0 : index
    %c0_44 = arith.constant 0 : index
    %119 = vector.load %arg6[%c0_43, %c0_44] : memref<128x256xbf16, #tpu.memory_space<vmem>>, vector<128x256xbf16>
    %120 = arith.truncf %118 : vector<16x128xf32> to vector<16x128xbf16>
    %cst_45 = arith.constant dense<0.000000e+00> : vector<16x256xf32>
    %121 = tpu.matmul %120, %119, %cst_45 {dimension_numbers = #tpu.dot_dimension_numbers<[1], [0], [0], [1], [0, 0, 1, 1], [], []>} : vector<16x128xbf16>, vector<128x256xbf16>, vector<16x256xf32> -> vector<16x256xf32>
    %122 = vector.extract_strided_slice %121 {offsets = [0, 0], sizes = [8, 128], strides = [1, 1]} : vector<16x256xf32> to vector<8x128xf32>
    %123 = vector.extract_strided_slice %121 {offsets = [8, 128], sizes = [8, 128], strides = [1, 1]} : vector<16x256xf32> to vector<8x128xf32>
    %124 = tpu.concatenate %122, %123 in 0 : vector<8x128xf32>, vector<8x128xf32> -> vector<16x128xf32>
    %c0_46 = arith.constant 0 : index
    %c0_47 = arith.constant 0 : index
    %125 = vector.load %arg7[%c0_46, %c0_47] : memref<16x128xf32, #tpu.memory_space<vmem>>, vector<16x128xf32>
    %126 = arith.addf %124, %125 : vector<16x128xf32>
    %c0_48 = arith.constant 0 : index
    %c0_49 = arith.constant 0 : index
    %127 = vector.load %arg9[%c0_48, %c0_49] : memref<16x128xf32, #tpu.memory_space<vmem>>, vector<16x128xf32>
    tpu.vector_store %arg9[%c0_48, %c0_49], %126 {strides = array<i32>} : memref<16x128xf32, #tpu.memory_space<vmem>>, vector<16x128xf32>,
    return
  }
}

</mosaic_0001>

<bundles_post_ra>
// kernel: tpu_custom_call.1
= control target key start
LH: loop header
LB: loop body
LE: loop exit
PB: predicated region body
PF: predicated region fallthrough
CT: control target
= control target key end

     0   :  { %16 = vsyncpa [#allocation3], 0  ;;  %s3974_s0 = inlined_call_operand.hbm [shape: f32[16,128], index: 0, kind: input, shape index: {}]   ;;  %s3975_s1 = inlined_call_operand.hbm [shape: bf16[128,256], index: 1, kind: input, shape index: {}]   ;;  %s3976_s2 = inlined_call_operand.hbm [shape: bf16[4,256,512], index: 2, kind: input, shape index: {}]   ;;  %s3977_s3 = inlined_call_operand.hbm [shape: f32[2,32,128], index: 3, kind: input, shape index: {}]   ;;  %s3978_s4 = inlined_call_operand.hbm [shape: bf16[128,256], index: 4, kind: input, shape index: {}]   ;;  %s3979_s5 = inlined_call_operand.hbm [shape: f32[16,128], index: 5, kind: input, shape index: {}]   ;;  %s3980_s6 = inlined_call_operand.hbm [shape: bf16[128,256], index: 6, kind: input, shape index: {}]   ;;  %s3981_s7 = inlined_call_operand.hbm [shape: f32[16,128], index: 7, kind: input, shape index: {}]   ;;  %s3982_s8 = inlined_call_operand.vmem [shape: f32[2], index: 8, kind: input, shape index: {}]   ;;  %s3983_s9 = inlined_call_operand.hbm [shape: f32[16,128], index: 9, kind: output, shape index: {0}]   ;;  %s3984_s10 = inlined_call_operand.hbm [shape: f32[2,32,128], index: 10, kind: output, shape index: {1}]  }
   0x1   :  { %17 = vsyncpa [#allocation7], 0 }
   0x2   :  { %18 = vsyncpa [#allocation10], 0 }
   0x3   :  { %19 = vsyncpa [#allocation13], 0 }
   0x4   :  { %20 = vsyncpa [#allocation16], 0 }
   0x5   :  { %21 = vsyncpa [#allocation5], 0 }
   0x6   :  { %22 = vsyncpa [#allocation4], 0 }
   0x7   :  { %23 = vsyncpa [#allocation20], 0  ;;  %s3802_s13 = smov [#allocation6]   ;;  %s3803_s15 = smov [#allocation9]  }
   0x8   :  { %s41_s14 = sshll.u32 %s3802_s13, 4  ;;  %s65_s16 = sshll.u32 %s3803_s15, 4  ;;  %s42_s14 = int_to_ptr.vmem [resolvable:$true] %s41_s14  ;;  %s66_s16 = int_to_ptr.vmem [resolvable:$true] %s65_s16 }
   0x9   :  { %s3582_s17 = scalar_lea.vmem %s42_s14, 2048  ;;  %p3587_p1 = scmp.lt.s32.totalorder %s42_s14, %s42_s14 }
   0xa   :  { %p3583_p0 = scmp.ne.s32.totalorder %s42_s14, %s3582_s17  ;;  %p3588_p2 = scmp.lt.s32.totalorder %s3582_s17, %s3582_s17 }
   0xc   :  { %p3589_p3 = por %p3588_p2, %p3587_p1 }
   0xe   :  { %p3590_p4 = pnand %p3589_p3, %p3583_p0 }
  0x10   :  { %3593 = shalt.err (!%p3590_p4)
}
  0x11   :  { %s3804_s18 = smov 128   ;;  %s3805_s19 = smov 8  }
  0x12   :  { %47 = dma.hbm_to_vmem [thread:$0]  %s3975_s1, 2048, %s42_s14, [#allocation7], %s3804_s18, %s3804_s18, %s3805_s19  }
  0x13   :  { %s3602_s22 = scalar_lea.vmem %s66_s16, 1024  ;;  %p3607_p6 = scmp.lt.s32.totalorder %s66_s16, %s66_s16 }
  0x14   :  { %p3603_p5 = scmp.ne.s32.totalorder %s66_s16, %s3602_s22  ;;  %p3608_p7 = scmp.lt.s32.totalorder %s3602_s22, %s3602_s22 }
  0x16   :  { %p3609_p8 = por %p3608_p7, %p3607_p6 }
  0x18   :  { %p3610_p9 = pnand %p3609_p8, %p3603_p5 }
  0x1a   :  { %3613 = shalt.err (!%p3610_p9)
}
  0x1b   :  { %71 = dma.hbm_to_vmem [thread:$0]  %s3977_s3, 1024, %s66_s16, [#allocation10], %s3804_s18, %s3804_s18, %s3805_s19  }
  0x1c   :  { %s3806_s25 = smov [#allocation12]   ;;  %s3807_s27 = smov [#allocation2]  }
  0x1d   :  { %s89_s26 = sshll.u32 %s3806_s25, 4  ;;  %s29_s28 = sshll.u32 %s3807_s27, 4  ;;  %s90_s26 = int_to_ptr.vmem [resolvable:$true] %s89_s26  ;;  %s30_s28 = int_to_ptr.vmem [resolvable:$true] %s29_s28 }
  0x1e   :  { %s3622_s1 = scalar_lea.vmem %s90_s26, 256  ;;  %p3627_p11 = scmp.lt.s32.totalorder %s90_s26, %s90_s26 }
  0x1f   :  { %p3623_p10 = scmp.ne.s32.totalorder %s90_s26, %s3622_s1  ;;  %p3628_p12 = scmp.lt.s32.totalorder %s3622_s1, %s3622_s1 }
  0x21   :  { %p3629_p13 = por %p3628_p12, %p3627_p11 }
  0x23   :  { %p3630_p0 = pnand %p3629_p13, %p3623_p10 }
  0x25   :  { %3633 = shalt.err (!%p3630_p0)
}
  0x26   :  { %95 = dma.hbm_to_vmem [thread:$0]  %s3979_s5, 256, %s90_s26, [#allocation13], %s3804_s18, %s3804_s18, %s3805_s19  }
  0x27   :  { %s3642_s3 = scalar_lea.vmem %s30_s28, 256  ;;  %p3647_p2 = scmp.lt.s32.totalorder %s30_s28, %s30_s28 }
  0x28   :  { %p3643_p1 = scmp.ne.s32.totalorder %s30_s28, %s3642_s3  ;;  %p3648_p3 = scmp.lt.s32.totalorder %s3642_s3, %s3642_s3 }
  0x2a   :  { %p3649_p4 = por %p3648_p3, %p3647_p2 }
  0x2c   :  { %p3650_p5 = pnand %p3649_p4, %p3643_p1 }
  0x2e   :  { %3653 = shalt.err (!%p3650_p5)
}
  0x2f   :  { %35 = dma.hbm_to_vmem [thread:$0]  %s3974_s0, 256, %s30_s28, [#allocation3], %s3804_s18, %s3804_s18, %s3805_s19  }
  0x30   :  { %s3808_s13 = smov [#allocation8]  }
  0x31   :  { %s53_s14 = sshll.u32 %s3808_s13, 4  ;;  %s54_s14 = int_to_ptr.vmem [resolvable:$true] %s53_s14 }
  0x32   :  { %s3662_s15 = scalar_lea.vmem %s54_s14, 32768  ;;  %p3667_p7 = scmp.lt.s32.totalorder %s54_s14, %s54_s14 }
  0x33   :  { %p3663_p6 = scmp.ne.s32.totalorder %s54_s14, %s3662_s15  ;;  %p3668_p8 = scmp.lt.s32.totalorder %s3662_s15, %s3662_s15 }
  0x35   :  { %p3669_p9 = por %p3668_p8, %p3667_p7 }
  0x37   :  { %p3670_p10 = pnand %p3669_p9, %p3663_p6 }
  0x39   :  { %3673 = shalt.err (!%p3670_p10)
}
  0x3a   :  { %s3809_s5 = smov 256   ;;  %s3810_s16 = smov 16  }
  0x3b   :  { %59 = dma.hbm_to_vmem [thread:$0]  %s3976_s2, 32768, %s54_s14, [#allocation7], %s3809_s5, %s3809_s5, %s3810_s16  }
  0x3c   :  { %s3811_s21 = smov [#allocation11]   ;;  %s3812_s0 = smov [#allocation14]  }
  0x3d   :  { %s77_s22 = sshll.u32 %s3811_s21, 4  ;;  %s101_s23 = sshll.u32 %s3812_s0, 4  ;;  %s78_s22 = int_to_ptr.vmem [resolvable:$true] %s77_s22  ;;  %s102_s23 = int_to_ptr.vmem [resolvable:$true] %s101_s23 }
  0x3e   :  { %s3682_s24 = scalar_lea.vmem %s78_s22, 2048  ;;  %p3687_p12 = scmp.lt.s32.totalorder %s78_s22, %s78_s22 }
  0x3f   :  { %p3683_p11 = scmp.ne.s32.totalorder %s78_s22, %s3682_s24  ;;  %p3688_p13 = scmp.lt.s32.totalorder %s3682_s24, %s3682_s24 }
  0x41   :  { %p3689_p0 = por %p3688_p13, %p3687_p12 }
  0x43   :  { %p3690_p1 = pnand %p3689_p0, %p3683_p11 }
  0x45   :  { %3693 = shalt.err (!%p3690_p1)
}
  0x46   :  { %83 = dma.hbm_to_vmem [thread:$0]  %s3978_s4, 2048, %s78_s22, [#allocation10], %s3804_s18, %s3804_s18, %s3805_s19  }
  0x47   :  { %s3702_s2 = scalar_lea.vmem %s102_s23, 2048  ;;  %p3707_p3 = scmp.lt.s32.totalorder %s102_s23, %s102_s23 }
  0x48   :  { %p3703_p2 = scmp.ne.s32.totalorder %s102_s23, %s3702_s2  ;;  %p3708_p4 = scmp.lt.s32.totalorder %s3702_s2, %s3702_s2 }
  0x4a   :  { %p3709_p5 = por %p3708_p4, %p3707_p3 }
  0x4c   :  { %p3710_p6 = pnand %p3709_p5, %p3703_p2 }
  0x4e   :  { %3713 = shalt.err (!%p3710_p6)
}
  0x4f   :  { %107 = dma.hbm_to_vmem [thread:$0]  %s3980_s6, 2048, %s102_s23, [#allocation13], %s3804_s18, %s3804_s18, %s3805_s19  }
  0x50   :  { %s3813_s1 = smov [#allocation15]   ;;  %s126_s4 = sshll.u32 %s3982_s8, 4  ;;  %s127_s4 = int_to_ptr.vmem [resolvable:$true] %s126_s4 }
  0x51   :  { %s113_s29 = sshll.u32 %s3813_s1, 4  ;;  %s114_s29 = int_to_ptr.vmem [resolvable:$true] %s113_s29 }
  0x52   :  { %s3722_s11 = scalar_lea.vmem %s114_s29, 256  ;;  %p3727_p8 = scmp.lt.s32.totalorder %s114_s29, %s114_s29 }
  0x53   :  { %p3723_p7 = scmp.ne.s32.totalorder %s114_s29, %s3722_s11  ;;  %p3728_p9 = scmp.lt.s32.totalorder %s3722_s11, %s3722_s11 }
  0x55   :  { %p3729_p10 = por %p3728_p9, %p3727_p8 }
  0x57   :  { %p3730_p11 = pnand %p3729_p10, %p3723_p7 }
  0x59   :  { %3733 = shalt.err (!%p3730_p11)
}
  0x5a   :  { %119 = dma.hbm_to_vmem [thread:$0]  %s3981_s7, 256, %s114_s29, [#allocation16], %s3804_s18, %s3804_s18, %s3805_s19  }
  0x5b   :  { %s3734_s13 = scalar_lea.vmem %s127_s4, 16  ;;  %p3739_p13 = scmp.lt.s32.totalorder %s127_s4, %s127_s4 }
  0x5c   :  { %p3735_p12 = scmp.ne.s32.totalorder %s127_s4, %s3734_s13  ;;  %p3740_p0 = scmp.lt.s32.totalorder %s3734_s13, %s3734_s13 }
  0x5e   :  { %p3741_p1 = por %p3740_p0, %p3739_p13 }
  0x60   :  { %p3742_p2 = pnand %p3741_p1, %p3735_p12 }
  0x62   :  { %3745 = shalt.err (!%p3742_p2)
}
  0x63   :  { %s3814_s8 = smov [#allocation17]  }
  0x64   :  { %129 = dma.vmem_to_smem %s127_s4, 16, %s3814_s8, [#allocation5]  }
  0x65   :  { %3786 = dma.done.wait [#allocation3], 256  }
  0x66   :  { %3787 = vsyncadd [#allocation3], 4294967040 }
  0x67   :  { %3788 = dma.done.wait [#allocation7], 34816  }
  0x68   :  { %3789 = vsyncadd [#allocation7], 4294932480 }
  0x69   :  { %3790 = dma.done.wait [#allocation10], 3072  }
  0x6a   :  { %3791 = vsyncadd [#allocation10], 4294964224 }
  0x6b   :  { %3792 = dma.done.wait [#allocation13], 2304  }
  0x6c   :  { %3793 = vsyncadd [#allocation13], 4294964992 }
  0x6d   :  { %3794 = dma.done.wait [#allocation16], 256  }
  0x6e   :  { %3795 = vsyncadd [#allocation16], 4294967040 }
  0x6f   :  { %3796 = dma.done.wait [#allocation5], 16  }
  0x70   :  { %3797 = vsyncadd [#allocation5], 4294967280 }
  0x71   :  { %157 = sfence }
  0x72   :  { %v3038_v0 = vld [vmem:[#allocation6 + $0x74] ss:$8 sps:$4 sm:$0xff]   ;;  %v3040_v1 = vld [vmem:[#allocation6 + $0x70] ss:$8 sps:$4 sm:$0xff]   ;;  %v3815_v2 = vmov 0   ;;  %s159_s7 = sld [smem:[#allocation17]] }
  0x73   :  { %292 = vmatprep.mubr.bf16.mxu0 %v3815_v2  ;;  %260 = vmatprep.subr.bf16.mxu0 %v3038_v0  ;;  %v3041_v3 = vld [vmem:[#allocation6 + $0x64] ss:$8 sps:$4 sm:$0xff]   ;;  %v3043_v4 = vld [vmem:[#allocation6 + $0x60] ss:$8 sps:$4 sm:$0xff]   ;;  %v3044_v5 = vld [vmem:[#allocation6 + $0x54] ss:$8 sps:$4 sm:$0xff]  }
  0x74   :  { %261 = vmatpush1.bf16.msra.mxu0 %v3040_v1  ;;  %v3046_v6 = vld [vmem:[#allocation6 + $0x50] ss:$8 sps:$4 sm:$0xff]   ;;  %v3047_v7 = vld [vmem:[#allocation6 + $0x44] ss:$8 sps:$4 sm:$0xff]   ;;  %v3049_v8 = vld [vmem:[#allocation6 + $0x40] ss:$8 sps:$4 sm:$0xff]  }
  0x75   :  { %262 = vmatprep.subr.bf16.mxu0 %v3041_v3  ;;  %v3050_v9 = vld [vmem:[#allocation6 + $0x34] ss:$8 sps:$4 sm:$0xff]   ;;  %v3067_v11 = vld [vmem:[#allocation8 + $0xe0] ss:$16 sps:$4 sm:$0xff]   ;;  %v3053_v14 = vld [vmem:[#allocation6 + $0x24] ss:$8 sps:$4 sm:$0xff]  }
  0x76   :  { %v3062_v10 = vld [vmem:[#allocation8 + $0xe4] ss:$16 sps:$4 sm:$0xff]   ;;  %v3052_v13 = vld [vmem:[#allocation6 + $0x30] ss:$8 sps:$4 sm:$0xff]   ;;  %v3055_v17 = vld [vmem:[#allocation6 + $0x20] ss:$8 sps:$4 sm:$0xff]  }
  0x77   :  { %698 = vmatprep.subr.bf16.mxu1 %v3062_v10  ;;  %v3068_v12 = vld [vmem:[#allocation8 + $0xc4] ss:$16 sps:$4 sm:$0xff]   ;;  %v3073_v15 = vld [vmem:[#allocation8 + $0xc0] ss:$16 sps:$4 sm:$0xff]   ;;  %v162_v27 = vld [vmem:[#allocation2 + $0x8] sm:$0xff]  ;;  %s2701_s14 = sld [smem:[#allocation17 + $0x1]] }
  0x78   :  { %263 = vmatpush1.bf16.msra.mxu0 %v3043_v4  ;;  %699 = vmatpush1.bf16.msra.mxu1 %v3067_v11  ;;  %v3074_v16 = vld [vmem:[#allocation8 + $0xa4] ss:$16 sps:$4 sm:$0xff]   ;;  %v3079_v19 = vld [vmem:[#allocation8 + $0xa0] ss:$16 sps:$4 sm:$0xff]   ;;  %v3066_v28 = vld [vmem:[#allocation8 + $0xec] ss:$16 sps:$4 sm:$0xff]  }
  0x79   :  { %264 = vmatprep.subr.bf16.mxu0 %v3044_v5  ;;  %700 = vmatprep.subr.bf16.mxu1 %v3068_v12  ;;  %v3056_v18 = vld [vmem:[#allocation6 + $0x14] ss:$8 sps:$4 sm:$0xff]   ;;  %v3058_v21 = vld [vmem:[#allocation6 + $0x10] ss:$8 sps:$4 sm:$0xff]   ;;  %v3059_v23 = vld [vmem:[#allocation6 + $0x4] ss:$8 sps:$4 sm:$0xff]  }
  0x7a   :  { %v3080_v20 = vld [vmem:[#allocation8 + $0x84] ss:$16 sps:$4 sm:$0xff]   ;;  %v3085_v22 = vld [vmem:[#allocation8 + $0x80] ss:$16 sps:$4 sm:$0xff]   ;;  %v3064_v32 = vld [vmem:[#allocation8 + $0xe8] ss:$16 sps:$4 sm:$0xff]  }
  0x7b   :  { %v3086_v24 = vld [vmem:[#allocation8 + $0x64] ss:$16 sps:$4 sm:$0xff]   ;;  %v3061_v25 = vld [vmem:[#allocation6] ss:$8 sps:$4 sm:$0xff]   ;;  %v3072_v34 = vld [vmem:[#allocation8 + $0xcc] ss:$16 sps:$4 sm:$0xff]  }
  0x7c   :  { %265 = vmatpush1.bf16.msra.mxu0 %v3046_v6  ;;  %701 = vmatpush1.bf16.msra.mxu1 %v3073_v15  ;;  %v161_v26 = vld [vmem:[#allocation2] sm:$0xff]  ;;  %v3070_v36 = vld [vmem:[#allocation8 + $0xc8] ss:$16 sps:$4 sm:$0xff]   ;;  %v3078_v37 = vld [vmem:[#allocation8 + $0xac] ss:$16 sps:$4 sm:$0xff]   ;;  %s3816_s15 = smov [#allocation19]  }
  0x7d   :  { %266 = vmatprep.subr.bf16.mxu0 %v3047_v7  ;;  %702 = vmatprep.subr.bf16.mxu1 %v3074_v16  ;;  %v3091_v29 = vld [vmem:[#allocation8 + $0x60] ss:$16 sps:$4 sm:$0xff]   ;;  %v3092_v30 = vld [vmem:[#allocation8 + $0x44] ss:$16 sps:$4 sm:$0xff]   ;;  %v179_v31 = vpack.c.bf16 %v162_v27, %v161_v26  ;;  %v3076_v40 = vld [vmem:[#allocation8 + $0xa8] ss:$16 sps:$4 sm:$0xff]   ;;  %v303_v27 = vstv %s159_s7 }
  0x7e   :  { %v3097_v33 = vld [vmem:[#allocation8 + $0x40] ss:$16 sps:$4 sm:$0xff]   ;;  %v3098_v35 = vld [vmem:[#allocation8 + $0x24] ss:$16 sps:$4 sm:$0xff]   ;;  %v3084_v42 = vld [vmem:[#allocation8 + $0x8c] ss:$16 sps:$4 sm:$0xff]  }
  0x7f   :  { %v3103_v38 = vld [vmem:[#allocation8 + $0x20] ss:$16 sps:$4 sm:$0xff]   ;;  %v3104_v39 = vld [vmem:[#allocation8 + $0x4] ss:$16 sps:$4 sm:$0xff]   ;;  %v3082_v44 = vld [vmem:[#allocation8 + $0x88] ss:$16 sps:$4 sm:$0xff]  }
  0x80   :  { %267 = vmatpush1.bf16.msra.mxu0 %v3049_v8  ;;  %703 = vmatpush1.bf16.msra.mxu1 %v3079_v19  ;;  %v3109_v41 = vld [vmem:[#allocation8] ss:$16 sps:$4 sm:$0xff]   ;;  %v3110_v43 = vld [vmem:[#allocation8 + $0x1e4] ss:$16 sps:$4 sm:$0xff]   ;;  %v3090_v45 = vld [vmem:[#allocation8 + $0x6c] ss:$16 sps:$4 sm:$0xff]  }
  0x81   :  { %268 = vmatprep.subr.bf16.mxu0 %v3050_v9  ;;  %704 = vmatprep.subr.bf16.mxu1 %v3080_v20  ;;  %v3115_v46 = vld [vmem:[#allocation8 + $0x1e0] ss:$16 sps:$4 sm:$0xff]   ;;  %v3116_v47 = vld [vmem:[#allocation8 + $0x1c4] ss:$16 sps:$4 sm:$0xff]   ;;  %v3088_v48 = vld [vmem:[#allocation8 + $0x68] ss:$16 sps:$4 sm:$0xff]  }
  0x82   :  { %v3096_v49 = vld [vmem:[#allocation8 + $0x4c] ss:$16 sps:$4 sm:$0xff]   ;;  %v3121_v50 = vld [vmem:[#allocation8 + $0x1c0] ss:$16 sps:$4 sm:$0xff]   ;;  %v3122_v51 = vld [vmem:[#allocation8 + $0x1a4] ss:$16 sps:$4 sm:$0xff]  }
  0x83   :  { %v3094_v52 = vld [vmem:[#allocation8 + $0x48] ss:$16 sps:$4 sm:$0xff]   ;;  %v3127_v53 = vld [vmem:[#allocation8 + $0x1a0] ss:$16 sps:$4 sm:$0xff]   ;;  %v3102_v54 = vld [vmem:[#allocation8 + $0x2c] ss:$16 sps:$4 sm:$0xff]  }
  0x84   :  { %269 = vmatpush1.bf16.msra.mxu0 %v3052_v13  ;;  %705 = vmatpush1.bf16.msra.mxu1 %v3085_v22  ;;  %v3128_v55 = vld [vmem:[#allocation8 + $0x184] ss:$16 sps:$4 sm:$0xff]   ;;  %v3100_v56 = vld [vmem:[#allocation8 + $0x28] ss:$16 sps:$4 sm:$0xff]   ;;  %v3133_v57 = vld [vmem:[#allocation8 + $0x180] ss:$16 sps:$4 sm:$0xff]  }
  0x85   :  { %270 = vmatprep.subr.bf16.mxu0 %v3053_v14  ;;  %706 = vmatprep.subr.bf16.mxu1 %v3086_v24  ;;  %v3108_v58 = vld [vmem:[#allocation8 + $0xc] ss:$16 sps:$4 sm:$0xff]   ;;  %v3134_v59 = vld [vmem:[#allocation8 + $0x164] ss:$16 sps:$4 sm:$0xff]   ;;  %v3106_v60 = vld [vmem:[#allocation8 + $0x8] ss:$16 sps:$4 sm:$0xff]  }
  0x86   :  { %v3139_v61 = vld [vmem:[#allocation8 + $0x160] ss:$16 sps:$4 sm:$0xff]   ;;  %v3114_v62 = vld [vmem:[#allocation8 + $0x1ec] ss:$16 sps:$4 sm:$0xff]   ;;  %v3140_v63 = vld [vmem:[#allocation8 + $0x144] ss:$16 sps:$4 sm:$0xff]  }
  0x87   :  { %v3112_v0 = vld [vmem:[#allocation8 + $0x1e8] ss:$16 sps:$4 sm:$0xff]   ;;  %v3120_v1 = vld [vmem:[#allocation8 + $0x1cc] ss:$16 sps:$4 sm:$0xff]   ;;  %v3145_v12 = vld [vmem:[#allocation8 + $0x140] ss:$16 sps:$4 sm:$0xff]  }
  0x88   :  { %271 = vmatpush1.bf16.msra.mxu0 %v3055_v17  ;;  %707 = vmatpush1.bf16.msra.mxu1 %v3091_v29  ;;  %v3118_v3 = vld [vmem:[#allocation8 + $0x1c8] ss:$16 sps:$4 sm:$0xff]   ;;  %v3126_v4 = vld [vmem:[#allocation8 + $0x1ac] ss:$16 sps:$4 sm:$0xff]   ;;  %v3146_v13 = vld [vmem:[#allocation8 + $0x124] ss:$16 sps:$4 sm:$0xff]  }
  0x89   :  { %272 = vmatprep.subr.bf16.mxu0 %v3056_v18  ;;  %708 = vmatprep.subr.bf16.mxu1 %v3092_v30  ;;  %v3124_v5 = vld [vmem:[#allocation8 + $0x1a8] ss:$16 sps:$4 sm:$0xff]   ;;  %v3132_v6 = vld [vmem:[#allocation8 + $0x18c] ss:$16 sps:$4 sm:$0xff]   ;;  %v3151_v16 = vld [vmem:[#allocation8 + $0x120] ss:$16 sps:$4 sm:$0xff]  }
  0x8a   :  { %v3130_v7 = vld [vmem:[#allocation8 + $0x188] ss:$16 sps:$4 sm:$0xff]   ;;  %v3138_v8 = vld [vmem:[#allocation8 + $0x16c] ss:$16 sps:$4 sm:$0xff]   ;;  %v3152_v17 = vld [vmem:[#allocation8 + $0x104] ss:$16 sps:$4 sm:$0xff]  }
  0x8b   :  { %v3136_v9 = vld [vmem:[#allocation8 + $0x168] ss:$16 sps:$4 sm:$0xff]   ;;  %v3144_v10 = vld [vmem:[#allocation8 + $0x14c] ss:$16 sps:$4 sm:$0xff]   ;;  %v3157_v20 = vld [vmem:[#allocation8 + $0x100] ss:$16 sps:$4 sm:$0xff]  }
  0x8c   :  { %273 = vmatpush1.bf16.msra.mxu0 %v3058_v21  ;;  %709 = vmatpush1.bf16.msra.mxu1 %v3097_v33  ;;  %v3142_v11 = vld [vmem:[#allocation8 + $0x148] ss:$16 sps:$4 sm:$0xff]   ;;  %v3150_v14 = vld [vmem:[#allocation8 + $0x12c] ss:$16 sps:$4 sm:$0xff]   ;;  %v3922_v21 = vld [vmem:[#allocation9] sm:$0xff]  ;;  %s2680_s5 = sshll.u32 %s3816_s15, 4  ;;  %s2681_s5 = int_to_ptr.vmem [resolvable:$true] %s2680_s5 }
  0x8d   :  { %274 = vmatprep.subr.bf16.mxu0 %v3059_v23  ;;  %710 = vmatprep.subr.bf16.mxu1 %v3098_v35  ;;  %v3148_v15 = vld [vmem:[#allocation8 + $0x128] ss:$16 sps:$4 sm:$0xff]   ;;  %v3156_v18 = vld [vmem:[#allocation8 + $0x10c] ss:$16 sps:$4 sm:$0xff]   ;;  %v3160_v24 = vld [vmem:[#allocation8 + $0x2e4] ss:$16 sps:$4 sm:$0xff]   ;;  %p3751_p4 = scmp.lt.s32.totalorder %s2681_s5, %s2681_s5 }
  0x8e   :  { %v3154_v19 = vld [vmem:[#allocation8 + $0x108] ss:$16 sps:$4 sm:$0xff]   ;;  %v3928_v33 = vld [vmem:[#allocation9 + $0x10] sm:$0xff]  ;;  %s3746_s16 = scalar_lea.vmem %s2681_s5, 1024 }
  0x8f   :  { %v3924_v22 = vld [vmem:[#allocation9 + $0x8] sm:$0xff]  ;;  %p3747_p3 = scmp.ne.s32.totalorder %s2681_s5, %s3746_s16  ;;  %p3752_p5 = scmp.lt.s32.totalorder %s3746_s16, %s3746_s16 }
  0x90   :  { %275 = vmatpush1.bf16.msra.mxu0 %v3061_v25  ;;  %711 = vmatpush1.bf16.msra.mxu1 %v3103_v38  ;;  %v377_v23 = vpack.c.bf16 %v3924_v22, %v3922_v21  ;;  %v3163_v25 = vld [vmem:[#allocation8 + $0x2ec] ss:$16 sps:$4 sm:$0xff]   ;;  %v3161_v38 = vld [vmem:[#allocation8 + $0x2e8] ss:$16 sps:$4 sm:$0xff]  }
  0x91   :  { %741 = vmatprep.subr.bf16.mxu0 %v3066_v28  ;;  %712 = vmatprep.subr.bf16.mxu1 %v3104_v39  ;;  %p3753_p6 = por %p3752_p5, %p3751_p4 }
  0x92   :  { %730 = vmatprep.mubr.bf16.mxu1 %v377_v23 }
  0x93   :  { %293 = vmatmul.mubr.bf16.vlgmr.msra.gmra.mxu0 %v179_v31  ;;  %p3754_p7 = pnand %p3753_p6, %p3747_p3 }
  0x94   :  { %742 = vmatpush1.bf16.msra.mxu0 %v3064_v32  ;;  %713 = vmatpush1.bf16.msra.mxu1 %v3109_v41  ;;  %v3169_v41 = vld [vmem:[#allocation8 + $0x2cc] ss:$16 sps:$4 sm:$0xff]  }
  0x95   :  { %743 = vmatprep.subr.bf16.mxu0 %v3072_v34  ;;  %714 = vmatprep.subr.bf16.mxu1 %v3110_v43  ;;  %v3930_v34 = vld [vmem:[#allocation9 + $0x18] sm:$0xff]  ;;  %v3164_v43 = vld [vmem:[#allocation8 + $0x2c0] ss:$16 sps:$4 sm:$0xff]  }
  0x96   :  { %773 = vmatprep.mubr.bf16.mxu0 %v377_v23  ;;  %v3227_v23 = vld [vmem:[#allocation8 + $0x388] ss:$16 sps:$4 sm:$0xff]  }
  0x98   :  { %744 = vmatpush1.bf16.msra.mxu0 %v3070_v36  ;;  %715 = vmatpush2.bf16.msra.mxu1 %v3115_v46  ;;  %v3175_v46 = vld [vmem:[#allocation8 + $0x2ac] ss:$16 sps:$4 sm:$0xff]  }
  0x99   :  { %745 = vmatprep.subr.bf16.mxu0 %v3078_v37  ;;  %716 = vmatprep.subr.bf16.mxu1 %v3116_v47  ;;  %v3158_v37 = vld [vmem:[#allocation8 + $0x2e0] ss:$16 sps:$4 sm:$0xff]  }
  0x9a   :  { %v3170_v47 = vld [vmem:[#allocation8 + $0x2a0] ss:$16 sps:$4 sm:$0xff]  }
  0x9c   :  { %746 = vmatpush1.bf16.msra.mxu0 %v3076_v40  ;;  %717 = vmatpush2.bf16.msra.mxu1 %v3121_v50  ;;  %v3166_v40 = vld [vmem:[#allocation8 + $0x2c4] ss:$16 sps:$4 sm:$0xff]   ;;  %v3181_v50 = vld [vmem:[#allocation8 + $0x28c] ss:$16 sps:$4 sm:$0xff]  }
  0x9d   :  { %747 = vmatprep.subr.bf16.mxu0 %v3084_v42  ;;  %718 = vmatprep.subr.bf16.mxu1 %v3122_v51  ;;  %v849_v42 = vpack.c.bf16 %v3930_v34, %v3928_v33  ;;  %v3176_v51 = vld [vmem:[#allocation8 + $0x280] ss:$16 sps:$4 sm:$0xff]  }
  0xa0   :  { %748 = vmatpush1.bf16.msra.mxu0 %v3082_v44  ;;  %719 = vmatpush2.bf16.msra.mxu1 %v3127_v53  ;;  %v3167_v44 = vld [vmem:[#allocation8 + $0x2c8] ss:$16 sps:$4 sm:$0xff]   ;;  %v3184_v53 = vld [vmem:[#allocation8 + $0x264] ss:$16 sps:$4 sm:$0xff]  }
  0xa1   :  { %749 = vmatprep.subr.bf16.mxu0 %v3090_v45  ;;  %720 = vmatprep.subr.bf16.mxu1 %v3128_v55  ;;  %v3172_v45 = vld [vmem:[#allocation8 + $0x2a4] ss:$16 sps:$4 sm:$0xff]   ;;  %v3182_v55 = vld [vmem:[#allocation8 + $0x260] ss:$16 sps:$4 sm:$0xff]  }
  0xa4   :  { %750 = vmatpush1.bf16.msra.mxu0 %v3088_v48  ;;  %721 = vmatpush2.bf16.msra.mxu1 %v3133_v57  ;;  %v3173_v48 = vld [vmem:[#allocation8 + $0x2a8] ss:$16 sps:$4 sm:$0xff]   ;;  %v3190_v57 = vld [vmem:[#allocation8 + $0x244] ss:$16 sps:$4 sm:$0xff]  }
  0xa5   :  { %751 = vmatprep.subr.bf16.mxu0 %v3096_v49  ;;  %722 = vmatprep.subr.bf16.mxu1 %v3134_v59  ;;  %v3178_v49 = vld [vmem:[#allocation8 + $0x284] ss:$16 sps:$4 sm:$0xff]   ;;  %v3188_v59 = vld [vmem:[#allocation8 + $0x240] ss:$16 sps:$4 sm:$0xff]  }
  0xa8   :  { %752 = vmatpush1.bf16.msra.mxu0 %v3094_v52  ;;  %723 = vmatpush2.bf16.msra.mxu1 %v3139_v61  ;;  %v3179_v52 = vld [vmem:[#allocation8 + $0x288] ss:$16 sps:$4 sm:$0xff]   ;;  %v3196_v61 = vld [vmem:[#allocation8 + $0x224] ss:$16 sps:$4 sm:$0xff]  }
  0xa9   :  { %753 = vmatprep.subr.bf16.mxu0 %v3102_v54  ;;  %724 = vmatprep.subr.bf16.mxu1 %v3140_v63  ;;  %v3187_v54 = vld [vmem:[#allocation8 + $0x26c] ss:$16 sps:$4 sm:$0xff]   ;;  %v3194_v63 = vld [vmem:[#allocation8 + $0x220] ss:$16 sps:$4 sm:$0xff]  }
  0xac   :  { %754 = vmatpush1.bf16.msra.mxu0 %v3100_v56  ;;  %725 = vmatpush2.bf16.msra.mxu1 %v3145_v12  ;;  %v3185_v56 = vld [vmem:[#allocation8 + $0x268] ss:$16 sps:$4 sm:$0xff]   ;;  %v3212_v12 = vld [vmem:[#allocation8 + $0x3c0] ss:$16 sps:$4 sm:$0xff]  }
  0xad   :  { %755 = vmatprep.subr.bf16.mxu0 %v3108_v58  ;;  %726 = vmatprep.subr.bf16.mxu1 %v3146_v13  ;;  %v3193_v58 = vld [vmem:[#allocation8 + $0x24c] ss:$16 sps:$4 sm:$0xff]   ;;  %v3215_v13 = vld [vmem:[#allocation8 + $0x3c8] ss:$16 sps:$4 sm:$0xff]  }
  0xb0   :  { %756 = vmatpush1.bf16.msra.mxu0 %v3106_v60  ;;  %727 = vmatpush2.bf16.msra.mxu1 %v3151_v16  ;;  %v3191_v60 = vld [vmem:[#allocation8 + $0x248] ss:$16 sps:$4 sm:$0xff]   ;;  %v3218_v16 = vld [vmem:[#allocation8 + $0x3a0] ss:$16 sps:$4 sm:$0xff]  }
  0xb1   :  { %757 = vmatprep.subr.bf16.mxu0 %v3114_v62  ;;  %728 = vmatprep.subr.bf16.mxu1 %v3152_v17  ;;  %v3199_v62 = vld [vmem:[#allocation8 + $0x22c] ss:$16 sps:$4 sm:$0xff]   ;;  %v3221_v17 = vld [vmem:[#allocation8 + $0x3a8] ss:$16 sps:$4 sm:$0xff]  }
  0xb4   :  { %758 = vmatpush2.bf16.msra.mxu0 %v3112_v0  ;;  %729 = vmatpush2.bf16.msra.mxu1 %v3157_v20  ;;  %v3197_v0 = vld [vmem:[#allocation8 + $0x228] ss:$16 sps:$4 sm:$0xff]   ;;  %v3224_v20 = vld [vmem:[#allocation8 + $0x380] ss:$16 sps:$4 sm:$0xff]  }
  0xb5   :  { %759 = vmatprep.subr.bf16.mxu0 %v3120_v1  ;;  %1170 = vmatprep.subr.bf16.mxu1 %v3160_v24  ;;  %v3202_v1 = vld [vmem:[#allocation8 + $0x204] ss:$16 sps:$4 sm:$0xff]  }
  0xb6   :  { %v3232_v24 = vld [vmem:[#allocation8 + $0x364] ss:$16 sps:$4 sm:$0xff]  }
  0xb8   :  { %760 = vmatpush2.bf16.msra.mxu0 %v3118_v3  ;;  %v3205_v3 = vld [vmem:[#allocation8 + $0x20c] ss:$16 sps:$4 sm:$0xff]  }
  0xb9   :  { %761 = vmatprep.subr.bf16.mxu0 %v3126_v4  ;;  %v3200_v4 = vld [vmem:[#allocation8 + $0x200] ss:$16 sps:$4 sm:$0xff]  }
  0xbc   :  { %762 = vmatpush2.bf16.msra.mxu0 %v3124_v5  ;;  %v3203_v5 = vld [vmem:[#allocation8 + $0x208] ss:$16 sps:$4 sm:$0xff]  }
  0xbd   :  { %763 = vmatprep.subr.bf16.mxu0 %v3132_v6  ;;  %v3208_v6 = vld [vmem:[#allocation8 + $0x3e4] ss:$16 sps:$4 sm:$0xff]  }
  0xc0   :  { %764 = vmatpush2.bf16.msra.mxu0 %v3130_v7  ;;  %v3211_v7 = vld [vmem:[#allocation8 + $0x3ec] ss:$16 sps:$4 sm:$0xff]  }
  0xc1   :  { %765 = vmatprep.subr.bf16.mxu0 %v3138_v8  ;;  %v3206_v8 = vld [vmem:[#allocation8 + $0x3e0] ss:$16 sps:$4 sm:$0xff]  }
  0xc4   :  { %766 = vmatpush2.bf16.msra.mxu0 %v3136_v9  ;;  %v3209_v9 = vld [vmem:[#allocation8 + $0x3e8] ss:$16 sps:$4 sm:$0xff]  }
  0xc5   :  { %767 = vmatprep.subr.bf16.mxu0 %v3144_v10  ;;  %v3214_v10 = vld [vmem:[#allocation8 + $0x3c4] ss:$16 sps:$4 sm:$0xff]  }
  0xc8   :  { %768 = vmatpush2.bf16.msra.mxu0 %v3142_v11  ;;  %v3217_v11 = vld [vmem:[#allocation8 + $0x3cc] ss:$16 sps:$4 sm:$0xff]  }
  0xc9   :  { %769 = vmatprep.subr.bf16.mxu0 %v3150_v14  ;;  %v3220_v14 = vld [vmem:[#allocation8 + $0x3a4] ss:$16 sps:$4 sm:$0xff]  }
  0xcc   :  { %770 = vmatpush2.bf16.msra.mxu0 %v3148_v15  ;;  %v3223_v15 = vld [vmem:[#allocation8 + $0x3ac] ss:$16 sps:$4 sm:$0xff]  }
  0xcd   :  { %771 = vmatprep.subr.bf16.mxu0 %v3156_v18  ;;  %v3226_v18 = vld [vmem:[#allocation8 + $0x384] ss:$16 sps:$4 sm:$0xff]  }
  0xd0   :  { %772 = vmatpush2.bf16.msra.mxu0 %v3154_v19  ;;  %v3229_v19 = vld [vmem:[#allocation8 + $0x38c] ss:$16 sps:$4 sm:$0xff]  }
  0xd1   :  { %1213 = vmatprep.subr.bf16.mxu0 %v3163_v25  ;;  %v3235_v25 = vld [vmem:[#allocation8 + $0x36c] ss:$16 sps:$4 sm:$0xff]  }
 0x153   :  { %v294_v26 = vpop.f32.mrf.mxu0 }
 0x154   :  { %v304_v30 = vmul.f32 %v303_v27, %v294_v26  ;;  %vm301_vm0 = vcmp.ge.f32.partialorder %v294_v26, 0.0 }
 0x155   :  { %v296_v28 = vpop.f32.mrf.mxu0 }
 0x156   :  { %v306_v35 = vsel %vm301_vm0, %v294_v26, %v304_v30  ;;  %v3230_v26 = vld [vmem:[#allocation8 + $0x360] ss:$16 sps:$4 sm:$0xff]   ;;  %v3238_v28 = vld [vmem:[#allocation8 + $0x344] ss:$16 sps:$4 sm:$0xff]  }
 0x157   :  { %v297_v29 = vpop.f32.mrf.mxu0  ;;  %v3236_v30 = vld [vmem:[#allocation8 + $0x340] ss:$16 sps:$4 sm:$0xff]  }
 0x158   :  { %v3241_v29 = vld [vmem:[#allocation8 + $0x34c] ss:$16 sps:$4 sm:$0xff]  }
 0x159   :  { %v298_v31 = vpop.f32.mrf.mxu0 }
 0x15a   :  { %vm302_vm1 = vcmp.ge.f32.partialorder %v298_v31, 0.0  ;;  %v305_v32 = vmul.f32 %v303_v27, %v298_v31  ;;  %v3233_v27 = vld [vmem:[#allocation8 + $0x368] ss:$16 sps:$4 sm:$0xff]  }
 0x15c   :  { %v307_v36 = vsel %vm302_vm1, %v298_v31, %v305_v32  ;;  %v3239_v31 = vld [vmem:[#allocation8 + $0x348] ss:$16 sps:$4 sm:$0xff]   ;;  %v3244_v32 = vld [vmem:[#allocation8 + $0x324] ss:$16 sps:$4 sm:$0xff]  }
 0x15d   :  { %v3932_v39 = vpack.c.bf16 %v307_v36, %v306_v35  ;;  %v3247_v35 = vld [vmem:[#allocation8 + $0x32c] ss:$16 sps:$4 sm:$0xff]   ;;  %v3242_v36 = vld [vmem:[#allocation8 + $0x320] ss:$16 sps:$4 sm:$0xff]  }
 0x15f   :  { %731 = vmatmul.mubr.bf16.vlgmr.msra.gmra.mxu1 %v3932_v39  ;;  %774 = vmatmul.mubr.bf16.vlgmr.msra.gmra.mxu0 %v3932_v39 }
 0x160   :  { %1171 = vmatpush1.bf16.msra.mxu1 %v3158_v37  ;;  %1214 = vmatpush1.bf16.msra.mxu0 %v3161_v38  ;;  %v3245_v37 = vld [vmem:[#allocation8 + $0x328] ss:$16 sps:$4 sm:$0xff]   ;;  %v3250_v38 = vld [vmem:[#allocation8 + $0x304] ss:$16 sps:$4 sm:$0xff]  }
 0x161   :  { %1172 = vmatprep.subr.bf16.mxu1 %v3166_v40  ;;  %1215 = vmatprep.subr.bf16.mxu0 %v3169_v41  ;;  %v3253_v40 = vld [vmem:[#allocation8 + $0x30c] ss:$16 sps:$4 sm:$0xff]   ;;  %v3248_v41 = vld [vmem:[#allocation8 + $0x300] ss:$16 sps:$4 sm:$0xff]  }
 0x162   :  { %1202 = vmatprep.mubr.bf16.mxu1 %v849_v42  ;;  %1245 = vmatprep.mubr.bf16.mxu0 %v849_v42  ;;  %v3251_v42 = vld [vmem:[#allocation8 + $0x308] ss:$16 sps:$4 sm:$0xff]  }
 0x164   :  { %1173 = vmatpush1.bf16.msra.mxu1 %v3164_v43  ;;  %1216 = vmatpush1.bf16.msra.mxu0 %v3167_v44  ;;  %v3256_v43 = vld [vmem:[#allocation8 + $0x4e4] ss:$16 sps:$4 sm:$0xff]   ;;  %v3259_v44 = vld [vmem:[#allocation8 + $0x4ec] ss:$16 sps:$4 sm:$0xff]  }
 0x165   :  { %1174 = vmatprep.subr.bf16.mxu1 %v3172_v45  ;;  %1217 = vmatprep.subr.bf16.mxu0 %v3175_v46  ;;  %v3254_v45 = vld [vmem:[#allocation8 + $0x4e0] ss:$16 sps:$4 sm:$0xff]   ;;  %v3257_v46 = vld [vmem:[#allocation8 + $0x4e8] ss:$16 sps:$4 sm:$0xff]  }
 0x168   :  { %1175 = vmatpush1.bf16.msra.mxu1 %v3170_v47  ;;  %1218 = vmatpush1.bf16.msra.mxu0 %v3173_v48  ;;  %v3262_v47 = vld [vmem:[#allocation8 + $0x4c4] ss:$16 sps:$4 sm:$0xff]   ;;  %v3265_v48 = vld [vmem:[#allocation8 + $0x4cc] ss:$16 sps:$4 sm:$0xff]  }
 0x169   :  { %1176 = vmatprep.subr.bf16.mxu1 %v3178_v49  ;;  %1219 = vmatprep.subr.bf16.mxu0 %v3181_v50  ;;  %v3260_v49 = vld [vmem:[#allocation8 + $0x4c0] ss:$16 sps:$4 sm:$0xff]   ;;  %v3263_v50 = vld [vmem:[#allocation8 + $0x4c8] ss:$16 sps:$4 sm:$0xff]  }
 0x16c   :  { %1177 = vmatpush1.bf16.msra.mxu1 %v3176_v51  ;;  %1220 = vmatpush1.bf16.msra.mxu0 %v3179_v52  ;;  %v3268_v51 = vld [vmem:[#allocation8 + $0x4a4] ss:$16 sps:$4 sm:$0xff]   ;;  %v3271_v52 = vld [vmem:[#allocation8 + $0x4ac] ss:$16 sps:$4 sm:$0xff]  }
 0x16d   :  { %1178 = vmatprep.subr.bf16.mxu1 %v3184_v53  ;;  %1221 = vmatprep.subr.bf16.mxu0 %v3187_v54  ;;  %v3266_v53 = vld [vmem:[#allocation8 + $0x4a0] ss:$16 sps:$4 sm:$0xff]   ;;  %v3269_v54 = vld [vmem:[#allocation8 + $0x4a8] ss:$16 sps:$4 sm:$0xff]  }
 0x170   :  { %1179 = vmatpush1.bf16.msra.mxu1 %v3182_v55  ;;  %1222 = vmatpush1.bf16.msra.mxu0 %v3185_v56  ;;  %v3274_v55 = vld [vmem:[#allocation8 + $0x484] ss:$16 sps:$4 sm:$0xff]   ;;  %v3277_v56 = vld [vmem:[#allocation8 + $0x48c] ss:$16 sps:$4 sm:$0xff]  }
 0x171   :  { %1180 = vmatprep.subr.bf16.mxu1 %v3190_v57  ;;  %1223 = vmatprep.subr.bf16.mxu0 %v3193_v58  ;;  %v3272_v57 = vld [vmem:[#allocation8 + $0x480] ss:$16 sps:$4 sm:$0xff]   ;;  %v3280_v58 = vld [vmem:[#allocation8 + $0x464] ss:$16 sps:$4 sm:$0xff]  }
 0x174   :  { %1181 = vmatpush1.bf16.msra.mxu1 %v3188_v59  ;;  %1224 = vmatpush1.bf16.msra.mxu0 %v3191_v60  ;;  %v3283_v59 = vld [vmem:[#allocation8 + $0x46c] ss:$16 sps:$4 sm:$0xff]   ;;  %v3278_v60 = vld [vmem:[#allocation8 + $0x460] ss:$16 sps:$4 sm:$0xff]  }
 0x175   :  { %1182 = vmatprep.subr.bf16.mxu1 %v3196_v61  ;;  %1225 = vmatprep.subr.bf16.mxu0 %v3199_v62  ;;  %v3281_v61 = vld [vmem:[#allocation8 + $0x468] ss:$16 sps:$4 sm:$0xff]   ;;  %v3286_v62 = vld [vmem:[#allocation8 + $0x444] ss:$16 sps:$4 sm:$0xff]  }
 0x178   :  { %1183 = vmatpush1.bf16.msra.mxu1 %v3194_v63  ;;  %1226 = vmatpush1.bf16.msra.mxu0 %v3197_v0  ;;  %v3289_v63 = vld [vmem:[#allocation8 + $0x44c] ss:$16 sps:$4 sm:$0xff]   ;;  %v3284_v0 = vld [vmem:[#allocation8 + $0x440] ss:$16 sps:$4 sm:$0xff]  }
 0x179   :  { %1184 = vmatprep.subr.bf16.mxu1 %v3202_v1  ;;  %1227 = vmatprep.subr.bf16.mxu0 %v3205_v3  ;;  %v3287_v1 = vld [vmem:[#allocation8 + $0x448] ss:$16 sps:$4 sm:$0xff]   ;;  %v3292_v3 = vld [vmem:[#allocation8 + $0x424] ss:$16 sps:$4 sm:$0xff]  }
 0x17c   :  { %1185 = vmatpush1.bf16.msra.mxu1 %v3200_v4  ;;  %1228 = vmatpush1.bf16.msra.mxu0 %v3203_v5  ;;  %v3295_v4 = vld [vmem:[#allocation8 + $0x42c] ss:$16 sps:$4 sm:$0xff]   ;;  %v3290_v5 = vld [vmem:[#allocation8 + $0x420] ss:$16 sps:$4 sm:$0xff]  }
 0x17d   :  { %1186 = vmatprep.subr.bf16.mxu1 %v3208_v6  ;;  %1229 = vmatprep.subr.bf16.mxu0 %v3211_v7  ;;  %v3293_v6 = vld [vmem:[#allocation8 + $0x428] ss:$16 sps:$4 sm:$0xff]   ;;  %v3298_v7 = vld [vmem:[#allocation8 + $0x404] ss:$16 sps:$4 sm:$0xff]  }
 0x180   :  { %1187 = vmatpush2.bf16.msra.mxu1 %v3206_v8  ;;  %1230 = vmatpush2.bf16.msra.mxu0 %v3209_v9  ;;  %v3301_v8 = vld [vmem:[#allocation8 + $0x40c] ss:$16 sps:$4 sm:$0xff]   ;;  %v3296_v9 = vld [vmem:[#allocation8 + $0x400] ss:$16 sps:$4 sm:$0xff]  }
 0x181   :  { %1188 = vmatprep.subr.bf16.mxu1 %v3214_v10  ;;  %1231 = vmatprep.subr.bf16.mxu0 %v3217_v11  ;;  %v3299_v10 = vld [vmem:[#allocation8 + $0x408] ss:$16 sps:$4 sm:$0xff]   ;;  %v3304_v11 = vld [vmem:[#allocation8 + $0x5e4] ss:$16 sps:$4 sm:$0xff]  }
 0x184   :  { %1189 = vmatpush2.bf16.msra.mxu1 %v3212_v12  ;;  %1232 = vmatpush2.bf16.msra.mxu0 %v3215_v13  ;;  %v3307_v12 = vld [vmem:[#allocation8 + $0x5ec] ss:$16 sps:$4 sm:$0xff]   ;;  %v3302_v13 = vld [vmem:[#allocation8 + $0x5e0] ss:$16 sps:$4 sm:$0xff]  }
 0x185   :  { %1190 = vmatprep.subr.bf16.mxu1 %v3220_v14  ;;  %1233 = vmatprep.subr.bf16.mxu0 %v3223_v15  ;;  %v3305_v14 = vld [vmem:[#allocation8 + $0x5e8] ss:$16 sps:$4 sm:$0xff]   ;;  %v3310_v15 = vld [vmem:[#allocation8 + $0x5c4] ss:$16 sps:$4 sm:$0xff]  }
 0x188   :  { %1191 = vmatpush2.bf16.msra.mxu1 %v3218_v16  ;;  %1234 = vmatpush2.bf16.msra.mxu0 %v3221_v17  ;;  %v3313_v16 = vld [vmem:[#allocation8 + $0x5cc] ss:$16 sps:$4 sm:$0xff]   ;;  %v3308_v17 = vld [vmem:[#allocation8 + $0x5c0] ss:$16 sps:$4 sm:$0xff]  }
 0x189   :  { %1192 = vmatprep.subr.bf16.mxu1 %v3226_v18  ;;  %1235 = vmatprep.subr.bf16.mxu0 %v3229_v19  ;;  %v3311_v18 = vld [vmem:[#allocation8 + $0x5c8] ss:$16 sps:$4 sm:$0xff]   ;;  %v3316_v19 = vld [vmem:[#allocation8 + $0x5a4] ss:$16 sps:$4 sm:$0xff]  }
 0x18c   :  { %1193 = vmatpush2.bf16.msra.mxu1 %v3224_v20  ;;  %1236 = vmatpush2.bf16.msra.mxu0 %v3227_v23  ;;  %v3319_v20 = vld [vmem:[#allocation8 + $0x5ac] ss:$16 sps:$4 sm:$0xff]   ;;  %v3314_v23 = vld [vmem:[#allocation8 + $0x5a0] ss:$16 sps:$4 sm:$0xff]  }
 0x18d   :  { %1194 = vmatprep.subr.bf16.mxu1 %v3232_v24  ;;  %1237 = vmatprep.subr.bf16.mxu0 %v3235_v25  ;;  %v3317_v24 = vld [vmem:[#allocation8 + $0x5a8] ss:$16 sps:$4 sm:$0xff]   ;;  %v3322_v25 = vld [vmem:[#allocation8 + $0x584] ss:$16 sps:$4 sm:$0xff]  }
 0x190   :  { %1195 = vmatpush2.bf16.msra.mxu1 %v3230_v26  ;;  %1238 = vmatpush2.bf16.msra.mxu0 %v3233_v27  ;;  %v3325_v26 = vld [vmem:[#allocation8 + $0x58c] ss:$16 sps:$4 sm:$0xff]   ;;  %v3320_v27 = vld [vmem:[#allocation8 + $0x580] ss:$16 sps:$4 sm:$0xff]  }
 0x191   :  { %1196 = vmatprep.subr.bf16.mxu1 %v3238_v28  ;;  %1239 = vmatprep.subr.bf16.mxu0 %v3241_v29  ;;  %v3323_v28 = vld [vmem:[#allocation8 + $0x588] ss:$16 sps:$4 sm:$0xff]   ;;  %v3328_v29 = vld [vmem:[#allocation8 + $0x564] ss:$16 sps:$4 sm:$0xff]  }
 0x194   :  { %1197 = vmatpush2.bf16.msra.mxu1 %v3236_v30  ;;  %1240 = vmatpush2.bf16.msra.mxu0 %v3239_v31  ;;  %v3331_v30 = vld [vmem:[#allocation8 + $0x56c] ss:$16 sps:$4 sm:$0xff]   ;;  %v3326_v31 = vld [vmem:[#allocation8 + $0x560] ss:$16 sps:$4 sm:$0xff]  }
 0x195   :  { %1198 = vmatprep.subr.bf16.mxu1 %v3244_v32  ;;  %1241 = vmatprep.subr.bf16.mxu0 %v3247_v35  ;;  %v3329_v32 = vld [vmem:[#allocation8 + $0x568] ss:$16 sps:$4 sm:$0xff]   ;;  %v3334_v35 = vld [vmem:[#allocation8 + $0x544] ss:$16 sps:$4 sm:$0xff]  }
 0x198   :  { %1199 = vmatpush2.bf16.msra.mxu1 %v3242_v36  ;;  %1242 = vmatpush2.bf16.msra.mxu0 %v3245_v37  ;;  %v3337_v36 = vld [vmem:[#allocation8 + $0x54c] ss:$16 sps:$4 sm:$0xff]   ;;  %v3940_v37 = vld [vmem:[#allocation9 + $0x20] sm:$0xff] }
 0x199   :  { %1200 = vmatprep.subr.bf16.mxu1 %v3250_v38  ;;  %1243 = vmatprep.subr.bf16.mxu0 %v3253_v40  ;;  %v3942_v38 = vld [vmem:[#allocation9 + $0x28] sm:$0xff] }
 0x19a   :  { %v1407_v40 = vpack.c.bf16 %v3942_v38, %v3940_v37 }
 0x19c   :  { %1201 = vmatpush2.bf16.msra.mxu1 %v3248_v41  ;;  %1244 = vmatpush2.bf16.msra.mxu0 %v3251_v42  ;;  %v3332_v41 = vld [vmem:[#allocation8 + $0x540] ss:$16 sps:$4 sm:$0xff]   ;;  %v3335_v42 = vld [vmem:[#allocation8 + $0x548] ss:$16 sps:$4 sm:$0xff]  }
 0x19d   :  { %1728 = vmatprep.subr.bf16.mxu1 %v3256_v43  ;;  %1771 = vmatprep.subr.bf16.mxu0 %v3259_v44  ;;  %v3340_v43 = vld [vmem:[#allocation8 + $0x524] ss:$16 sps:$4 sm:$0xff]   ;;  %v3343_v44 = vld [vmem:[#allocation8 + $0x52c] ss:$16 sps:$4 sm:$0xff]  }
 0x19f   :  { %1203 = vmatmul.mubr.bf16.vlgmr.msra.gmra.mxu1 %v3932_v39  ;;  %1246 = vmatmul.mubr.bf16.vlgmr.msra.gmra.mxu0 %v3932_v39  ;;  %v3275_v39 = vld [vmem:[#allocation8 + $0x488] ss:$16 sps:$4 sm:$0xff]  }
 0x1a0   :  { %1729 = vmatpush1.bf16.msra.mxu1 %v3254_v45  ;;  %1772 = vmatpush1.bf16.msra.mxu0 %v3257_v46  ;;  %v3338_v45 = vld [vmem:[#allocation8 + $0x520] ss:$16 sps:$4 sm:$0xff]   ;;  %v3341_v46 = vld [vmem:[#allocation8 + $0x528] ss:$16 sps:$4 sm:$0xff]  }
 0x1a1   :  { %1730 = vmatprep.subr.bf16.mxu1 %v3262_v47  ;;  %1773 = vmatprep.subr.bf16.mxu0 %v3265_v48  ;;  %v3346_v47 = vld [vmem:[#allocation8 + $0x504] ss:$16 sps:$4 sm:$0xff]   ;;  %v3349_v48 = vld [vmem:[#allocation8 + $0x50c] ss:$16 sps:$4 sm:$0xff]  }
 0x1a2   :  { %1760 = vmatprep.mubr.bf16.mxu1 %v1407_v40  ;;  %1803 = vmatprep.mubr.bf16.mxu0 %v1407_v40  ;;  %v3361_v40 = vld [vmem:[#allocation8 + $0x6cc] ss:$16 sps:$4 sm:$0xff]  }
 0x1a4   :  { %1731 = vmatpush1.bf16.msra.mxu1 %v3260_v49  ;;  %1774 = vmatpush1.bf16.msra.mxu0 %v3263_v50  ;;  %v3344_v49 = vld [vmem:[#allocation8 + $0x500] ss:$16 sps:$4 sm:$0xff]   ;;  %v3347_v50 = vld [vmem:[#allocation8 + $0x508] ss:$16 sps:$4 sm:$0xff]  }
 0x1a5   :  { %1732 = vmatprep.subr.bf16.mxu1 %v3268_v51  ;;  %1775 = vmatprep.subr.bf16.mxu0 %v3271_v52  ;;  %v3352_v51 = vld [vmem:[#allocation8 + $0x6e4] ss:$16 sps:$4 sm:$0xff]   ;;  %v3355_v52 = vld [vmem:[#allocation8 + $0x6ec] ss:$16 sps:$4 sm:$0xff]  }
 0x1a8   :  { %1733 = vmatpush1.bf16.msra.mxu1 %v3266_v53  ;;  %1776 = vmatpush1.bf16.msra.mxu0 %v3269_v54 }
 0x1a9   :  { %1734 = vmatprep.subr.bf16.mxu1 %v3274_v55  ;;  %1777 = vmatprep.subr.bf16.mxu0 %v3277_v56 }
 0x1ac   :  { %1735 = vmatpush1.bf16.msra.mxu1 %v3272_v57  ;;  %1778 = vmatpush1.bf16.msra.mxu0 %v3275_v39 }
 0x1ad   :  { %1736 = vmatprep.subr.bf16.mxu1 %v3280_v58  ;;  %1779 = vmatprep.subr.bf16.mxu0 %v3283_v59 }
 0x1b0   :  { %1737 = vmatpush1.bf16.msra.mxu1 %v3278_v60  ;;  %1780 = vmatpush1.bf16.msra.mxu0 %v3281_v61 }
 0x1b1   :  { %1738 = vmatprep.subr.bf16.mxu1 %v3286_v62  ;;  %1781 = vmatprep.subr.bf16.mxu0 %v3289_v63 }
 0x1b4   :  { %1739 = vmatpush1.bf16.msra.mxu1 %v3284_v0  ;;  %1782 = vmatpush1.bf16.msra.mxu0 %v3287_v1 }
 0x1b5   :  { %1740 = vmatprep.subr.bf16.mxu1 %v3292_v3  ;;  %1783 = vmatprep.subr.bf16.mxu0 %v3295_v4 }
 0x1b8   :  { %1741 = vmatpush1.bf16.msra.mxu1 %v3290_v5  ;;  %1784 = vmatpush1.bf16.msra.mxu0 %v3293_v6 }
 0x1b9   :  { %1742 = vmatprep.subr.bf16.mxu1 %v3298_v7  ;;  %1785 = vmatprep.subr.bf16.mxu0 %v3301_v8 }
 0x1bc   :  { %1743 = vmatpush1.bf16.msra.mxu1 %v3296_v9  ;;  %1786 = vmatpush1.bf16.msra.mxu0 %v3299_v10 }
 0x1bd   :  { %1744 = vmatprep.subr.bf16.mxu1 %v3304_v11  ;;  %1787 = vmatprep.subr.bf16.mxu0 %v3307_v12 }
 0x1c0   :  { %1745 = vmatpush2.bf16.msra.mxu1 %v3302_v13  ;;  %1788 = vmatpush2.bf16.msra.mxu0 %v3305_v14 }
 0x1c1   :  { %1746 = vmatprep.subr.bf16.mxu1 %v3310_v15  ;;  %1789 = vmatprep.subr.bf16.mxu0 %v3313_v16 }
 0x1c4   :  { %1747 = vmatpush2.bf16.msra.mxu1 %v3308_v17  ;;  %1790 = vmatpush2.bf16.msra.mxu0 %v3311_v18 }
 0x1c5   :  { %1748 = vmatprep.subr.bf16.mxu1 %v3316_v19  ;;  %1791 = vmatprep.subr.bf16.mxu0 %v3319_v20 }
 0x1c8   :  { %1749 = vmatpush2.bf16.msra.mxu1 %v3314_v23  ;;  %1792 = vmatpush2.bf16.msra.mxu0 %v3317_v24 }
 0x1c9   :  { %1750 = vmatprep.subr.bf16.mxu1 %v3322_v25  ;;  %1793 = vmatprep.subr.bf16.mxu0 %v3325_v26 }
 0x1cc   :  { %1751 = vmatpush2.bf16.msra.mxu1 %v3320_v27  ;;  %1794 = vmatpush2.bf16.msra.mxu0 %v3323_v28 }
 0x1cd   :  { %1752 = vmatprep.subr.bf16.mxu1 %v3328_v29  ;;  %1795 = vmatprep.subr.bf16.mxu0 %v3331_v30  ;;  %v3948_v29 = vld [vmem:[#allocation9 + $0x30] sm:$0xff]  ;;  %v3950_v30 = vld [vmem:[#allocation9 + $0x38] sm:$0xff] }
 0x1d0   :  { %1753 = vmatpush2.bf16.msra.mxu1 %v3326_v31  ;;  %1796 = vmatpush2.bf16.msra.mxu0 %v3329_v32  ;;  %v3350_v31 = vld [vmem:[#allocation8 + $0x6e0] ss:$16 sps:$4 sm:$0xff]   ;;  %v3353_v32 = vld [vmem:[#allocation8 + $0x6e8] ss:$16 sps:$4 sm:$0xff]  }
 0x1d1   :  { %1754 = vmatprep.subr.bf16.mxu1 %v3334_v35  ;;  %1797 = vmatprep.subr.bf16.mxu0 %v3337_v36  ;;  %v3358_v36 = vld [vmem:[#allocation8 + $0x6c4] ss:$16 sps:$4 sm:$0xff]  }
 0x1d4   :  { %1755 = vmatpush2.bf16.msra.mxu1 %v3332_v41  ;;  %1798 = vmatpush2.bf16.msra.mxu0 %v3335_v42  ;;  %v3359_v41 = vld [vmem:[#allocation8 + $0x6c8] ss:$16 sps:$4 sm:$0xff]   ;;  %v3364_v42 = vld [vmem:[#allocation8 + $0x6a4] ss:$16 sps:$4 sm:$0xff]  }
 0x1d5   :  { %1756 = vmatprep.subr.bf16.mxu1 %v3340_v43  ;;  %1799 = vmatprep.subr.bf16.mxu0 %v3343_v44  ;;  %v3367_v43 = vld [vmem:[#allocation8 + $0x6ac] ss:$16 sps:$4 sm:$0xff]  }
 0x1d8   :  { %1757 = vmatpush2.bf16.msra.mxu1 %v3338_v45  ;;  %1800 = vmatpush2.bf16.msra.mxu0 %v3341_v46 }
 0x1d9   :  { %1758 = vmatprep.subr.bf16.mxu1 %v3346_v47  ;;  %1801 = vmatprep.subr.bf16.mxu0 %v3349_v48  ;;  %v3362_v47 = vld [vmem:[#allocation8 + $0x6a0] ss:$16 sps:$4 sm:$0xff]   ;;  %v3365_v48 = vld [vmem:[#allocation8 + $0x6a8] ss:$16 sps:$4 sm:$0xff]  }
 0x1dc   :  { %1759 = vmatpush2.bf16.msra.mxu1 %v3344_v49  ;;  %1802 = vmatpush2.bf16.msra.mxu0 %v3347_v50  ;;  %v3370_v49 = vld [vmem:[#allocation8 + $0x684] ss:$16 sps:$4 sm:$0xff]   ;;  %v3373_v50 = vld [vmem:[#allocation8 + $0x68c] ss:$16 sps:$4 sm:$0xff]  }
 0x1dd   :  { %2201 = vmatprep.subr.bf16.mxu1 %v3352_v51  ;;  %2244 = vmatprep.subr.bf16.mxu0 %v3355_v52 }
 0x21f   :  { %v732_v53 = vpop.f32.mrf.mxu1  ;;  %v775_v0 = vpop.f32.mrf.mxu0 }
 0x220   :  { %v2846_v54 = vmul.f32 -1.442695, %v732_v53  ;;  %v3368_v53 = vld [vmem:[#allocation8 + $0x680] ss:$16 sps:$4 sm:$0xff]  }
 0x221   :  { %v734_v55 = vpop.f32.mrf.mxu1  ;;  %v777_v3 = vpop.f32.mrf.mxu0 }
 0x222   :  { %3494 = vpow2.f32 %v2846_v54  ;;  %v2850_v39 = vmul.f32 -1.442695, %v734_v55  ;;  %v3371_v54 = vld [vmem:[#allocation8 + $0x688] ss:$16 sps:$4 sm:$0xff]   ;;  %v3376_v55 = vld [vmem:[#allocation8 + $0x664] ss:$16 sps:$4 sm:$0xff]  }
 0x223   :  { %v736_v56 = vpop.f32.mrf.mxu1  ;;  %v779_v7 = vpop.f32.mrf.mxu0 }
 0x224   :  { %v2847_v57 = vmul.f32 -1.442695, %v736_v56  ;;  %v3379_v56 = vld [vmem:[#allocation8 + $0x66c] ss:$16 sps:$4 sm:$0xff]  }
 0x225   :  { %v738_v58 = vpop.f32.mrf.mxu1  ;;  %v781_v12 = vpop.f32.mrf.mxu0 }
 0x226   :  { %3496 = vpow2.f32 %v2847_v57  ;;  %v2851_v59 = vmul.f32 -1.442695, %v738_v58  ;;  %v3374_v58 = vld [vmem:[#allocation8 + $0x660] ss:$16 sps:$4 sm:$0xff]  }
 0x227   :  { %3498 = vpow2.f32 %v2850_v39 }
 0x228   :  { %3500 = vpow2.f32 %v2851_v59  ;;  %v3377_v59 = vld [vmem:[#allocation8 + $0x668] ss:$16 sps:$4 sm:$0xff]  }
 0x22f   :  { %v3495_v60 = vpop.eup %3494 }
 0x230   :  { %v1268_v61 = vadd.f32 1.0, %v3495_v60  ;;  %v3382_v60 = vld [vmem:[#allocation8 + $0x644] ss:$16 sps:$4 sm:$0xff]  }
 0x232   :  { %3502 = vrcp.f32 %v1268_v61  ;;  %v3385_v61 = vld [vmem:[#allocation8 + $0x64c] ss:$16 sps:$4 sm:$0xff]  }
 0x233   :  { %v3497_v62 = vpop.eup %3496 }
 0x234   :  { %v1269_v63 = vadd.f32 1.0, %v3497_v62  ;;  %v3499_v1 = vpop.eup %3498 }
 0x235   :  { %v3501_v4 = vpop.eup %3500  ;;  %v1292_v5 = vadd.f32 1.0, %v3499_v1  ;;  %v3388_v1 = vld [vmem:[#allocation8 + $0x624] ss:$16 sps:$4 sm:$0xff]  }
 0x236   :  { %3504 = vrcp.f32 %v1269_v63  ;;  %v1293_v8 = vadd.f32 1.0, %v3501_v4  ;;  %v3380_v63 = vld [vmem:[#allocation8 + $0x640] ss:$16 sps:$4 sm:$0xff]  }
 0x237   :  { %3506 = vrcp.f32 %v1292_v5 }
 0x238   :  { %3508 = vrcp.f32 %v1293_v8  ;;  %v3394_v8 = vld [vmem:[#allocation8 + $0x604] ss:$16 sps:$4 sm:$0xff]  }
 0x23f   :  { %v3503_v6 = vpop.eup %3502 }
 0x240   :  { %v1304_v9 = vmul.f32 %v3503_v6, %v777_v3  ;;  %v3391_v3 = vld [vmem:[#allocation8 + $0x62c] ss:$16 sps:$4 sm:$0xff]   ;;  %v3386_v6 = vld [vmem:[#allocation8 + $0x620] ss:$16 sps:$4 sm:$0xff]  }
 0x242   :  { %v1308_v10 = vadd.f32 %v1304_v9, %v775_v0  ;;  %v3383_v0 = vld [vmem:[#allocation8 + $0x648] ss:$16 sps:$4 sm:$0xff]   ;;  %v3397_v9 = vld [vmem:[#allocation8 + $0x60c] ss:$16 sps:$4 sm:$0xff]  }
 0x243   :  { %v3505_v11 = vpop.eup %3504 }
 0x244   :  { %3510 = vtanh.f32 %v1308_v10  ;;  %v1305_v13 = vmul.f32 %v3505_v11, %v781_v12  ;;  %v3507_v15 = vpop.eup %3506  ;;  %v3392_v12 = vld [vmem:[#allocation8 + $0x600] ss:$16 sps:$4 sm:$0xff]  }
 0x245   :  { %v3509_v16 = vpop.eup %3508  ;;  %v1316_v17 = vsub.f32 1.0, %v3507_v15  ;;  %v1324_v20 = vmul.f32 %v3507_v15, %v3922_v21  ;;  %v1880_v21 = vpack.c.bf16 %v3950_v30, %v3948_v29  ;;  %v3403_v15 = vld [vmem:[#allocation8 + $0x7ec] ss:$16 sps:$4 sm:$0xff]  }
 0x246   :  { %v1309_v14 = vadd.f32 %v1305_v13, %v779_v7  ;;  %v1317_v23 = vsub.f32 1.0, %v3509_v16  ;;  %v1325_v27 = vmul.f32 %v3509_v16, %v3924_v22  ;;  %v3356_v22 = vld [vmem:[#allocation8 + $0x6c0] ss:$16 sps:$4 sm:$0xff]   ;;  %v3389_v7 = vld [vmem:[#allocation8 + $0x628] ss:$16 sps:$4 sm:$0xff]  }
 0x247   :  { %v3395_v13 = vld [vmem:[#allocation8 + $0x608] ss:$16 sps:$4 sm:$0xff]  }
 0x248   :  { %3512 = vtanh.f32 %v1309_v14  ;;  %v3400_v14 = vld [vmem:[#allocation8 + $0x7e4] ss:$16 sps:$4 sm:$0xff]  }
 0x251   :  { %v3511_v18 = vpop.eup %3510 }
 0x252   :  { %v1320_v19 = vmul.f32 %v3511_v18, %v1316_v17  ;;  %v3398_v18 = vld [vmem:[#allocation8 + $0x7e0] ss:$16 sps:$4 sm:$0xff]  }
 0x254   :  { %v1328_v24 = vadd.f32 %v1324_v20, %v1320_v19  ;;  %v3401_v19 = vld [vmem:[#allocation8 + $0x7e8] ss:$16 sps:$4 sm:$0xff]   ;;  %v3406_v20 = vld [vmem:[#allocation8 + $0x7c4] ss:$16 sps:$4 sm:$0xff]  }
 0x255   :  { %v3513_v25 = vpop.eup %3512 }
 0x256   :  { %v1321_v26 = vmul.f32 %v3513_v25, %v1317_v23  ;;  %1332 = vst [vmem:[#allocation19] sm:$0xff] %v1328_v24  ;;  %v3409_v23 = vld [vmem:[#allocation8 + $0x7cc] ss:$16 sps:$4 sm:$0xff]  }
 0x258   :  { %v1329_v28 = vadd.f32 %v1325_v27, %v1321_v26  ;;  %v3404_v27 = vld [vmem:[#allocation8 + $0x7c0] ss:$16 sps:$4 sm:$0xff]  }
 0x25a   :  { %1333 = vst [vmem:[#allocation19 + $0x8] sm:$0xff] %v1329_v28  ;;  %v1406_v35 = vpack.c.bf16 %v1329_v28, %v1328_v24  ;;  %v3407_v28 = vld [vmem:[#allocation8 + $0x7c8] ss:$16 sps:$4 sm:$0xff]  }
 0x25c   :  { %1761 = vmatmul.mubr.bf16.vlgmr.msra.gmra.mxu1 %v1406_v35  ;;  %1804 = vmatmul.mubr.bf16.vlgmr.msra.gmra.mxu0 %v1406_v35 }
 0x25d   :  { %2202 = vmatpush1.bf16.msra.mxu1 %v3350_v31  ;;  %2245 = vmatpush1.bf16.msra.mxu0 %v3353_v32  ;;  %v3412_v31 = vld [vmem:[#allocation8 + $0x7a4] ss:$16 sps:$4 sm:$0xff]   ;;  %v3415_v32 = vld [vmem:[#allocation8 + $0x7ac] ss:$16 sps:$4 sm:$0xff]  }
 0x25e   :  { %2203 = vmatprep.subr.bf16.mxu1 %v3358_v36  ;;  %2246 = vmatprep.subr.bf16.mxu0 %v3361_v40 }
 0x25f   :  { %v1204_v44 = vpop.f32.mrf.mxu1  ;;  %2233 = vmatprep.mubr.bf16.mxu1 %v1880_v21  ;;  %2276 = vmatprep.mubr.bf16.mxu0 %v1880_v21  ;;  %v1247_v16 = vpop.f32.mrf.mxu0 }
 0x260   :  { %v2848_v45 = vmul.f32 -1.442695, %v1204_v44  ;;  %v3421_v44 = vld [vmem:[#allocation8 + $0x78c] ss:$16 sps:$4 sm:$0xff]  }
 0x261   :  { %v1206_v46 = vpop.f32.mrf.mxu1  ;;  %2204 = vmatpush1.bf16.msra.mxu1 %v3356_v22  ;;  %2247 = vmatpush1.bf16.msra.mxu0 %v3359_v41  ;;  %v1249_v24 = vpop.f32.mrf.mxu0  ;;  %v3410_v22 = vld [vmem:[#allocation8 + $0x7a0] ss:$16 sps:$4 sm:$0xff]   ;;  %v3413_v41 = vld [vmem:[#allocation8 + $0x7a8] ss:$16 sps:$4 sm:$0xff]  }
 0x262   :  { %3514 = vpow2.f32 %v2848_v45  ;;  %2205 = vmatprep.subr.bf16.mxu1 %v3364_v42  ;;  %2248 = vmatprep.subr.bf16.mxu0 %v3367_v43  ;;  %v2852_v57 = vmul.f32 -1.442695, %v1206_v46  ;;  %v3418_v43 = vld [vmem:[#allocation8 + $0x784] ss:$16 sps:$4 sm:$0xff]  }
 0x263   :  { %v1208_v51 = vpop.f32.mrf.mxu1  ;;  %v1251_v36 = vpop.f32.mrf.mxu0 }
 0x264   :  { %v2849_v52 = vmul.f32 -1.442695, %v1208_v51  ;;  %v3424_v51 = vld [vmem:[#allocation8 + $0x764] ss:$16 sps:$4 sm:$0xff]  }
 0x265   :  { %2206 = vmatpush1.bf16.msra.mxu1 %v3362_v47  ;;  %2249 = vmatpush1.bf16.msra.mxu0 %v3365_v48  ;;  %v1210_v39 = vpop.f32.mrf.mxu1  ;;  %v1253_v46 = vpop.f32.mrf.mxu0  ;;  %v3416_v48 = vld [vmem:[#allocation8 + $0x780] ss:$16 sps:$4 sm:$0xff]  }
 0x266   :  { %3516 = vpow2.f32 %v2849_v52  ;;  %2207 = vmatprep.subr.bf16.mxu1 %v3370_v49  ;;  %2250 = vmatprep.subr.bf16.mxu0 %v3373_v50  ;;  %v2853_v62 = vmul.f32 -1.442695, %v1210_v39  ;;  %v3419_v49 = vld [vmem:[#allocation8 + $0x788] ss:$16 sps:$4 sm:$0xff]   ;;  %v3427_v52 = vld [vmem:[#allocation8 + $0x76c] ss:$16 sps:$4 sm:$0xff]  }
 0x267   :  { %3518 = vpow2.f32 %v2852_v57  ;;  %v3428_v39 = vld [vmem:[#allocation8 + $0x740] ss:$16 sps:$4 sm:$0xff]  }
 0x268   :  { %3520 = vpow2.f32 %v2853_v62 }
 0x269   :  { %2208 = vmatpush1.bf16.msra.mxu1 %v3368_v53  ;;  %2251 = vmatpush1.bf16.msra.mxu0 %v3371_v54  ;;  %v3422_v53 = vld [vmem:[#allocation8 + $0x760] ss:$16 sps:$4 sm:$0xff]   ;;  %v3425_v54 = vld [vmem:[#allocation8 + $0x768] ss:$16 sps:$4 sm:$0xff]  }
 0x26a   :  { %2209 = vmatprep.subr.bf16.mxu1 %v3376_v55  ;;  %2252 = vmatprep.subr.bf16.mxu0 %v3379_v56  ;;  %v3430_v55 = vld [vmem:[#allocation8 + $0x744] ss:$16 sps:$4 sm:$0xff]   ;;  %v3433_v56 = vld [vmem:[#allocation8 + $0x74c] ss:$16 sps:$4 sm:$0xff]  }
 0x26d   :  { %2210 = vmatpush1.bf16.msra.mxu1 %v3374_v58  ;;  %2253 = vmatpush1.bf16.msra.mxu0 %v3377_v59  ;;  %v3431_v58 = vld [vmem:[#allocation8 + $0x748] ss:$16 sps:$4 sm:$0xff]   ;;  %v3436_v59 = vld [vmem:[#allocation8 + $0x724] ss:$16 sps:$4 sm:$0xff]  }
 0x26e   :  { %2211 = vmatprep.subr.bf16.mxu1 %v3382_v60  ;;  %2254 = vmatprep.subr.bf16.mxu0 %v3385_v61  ;;  %v3439_v60 = vld [vmem:[#allocation8 + $0x72c] ss:$16 sps:$4 sm:$0xff]  }
 0x26f   :  { %v3515_v4 = vpop.eup %3514 }
 0x270   :  { %v1270_v5 = vadd.f32 1.0, %v3515_v4  ;;  %v3445_v4 = vld [vmem:[#allocation8 + $0x70c] ss:$16 sps:$4 sm:$0xff]  }
 0x271   :  { %2212 = vmatpush1.bf16.msra.mxu1 %v3380_v63  ;;  %2255 = vmatpush1.bf16.msra.mxu0 %v3383_v0  ;;  %v3434_v0 = vld [vmem:[#allocation8 + $0x720] ss:$16 sps:$4 sm:$0xff]  }
 0x272   :  { %3522 = vrcp.f32 %v1270_v5  ;;  %2213 = vmatprep.subr.bf16.mxu1 %v3388_v1  ;;  %2256 = vmatprep.subr.bf16.mxu0 %v3391_v3  ;;  %v3437_v1 = vld [vmem:[#allocation8 + $0x728] ss:$16 sps:$4 sm:$0xff]   ;;  %v3442_v3 = vld [vmem:[#allocation8 + $0x704] ss:$16 sps:$4 sm:$0xff]  }
 0x273   :  { %v3517_v10 = vpop.eup %3516 }
 0x274   :  { %v1271_v11 = vadd.f32 1.0, %v3517_v10  ;;  %v3519_v17 = vpop.eup %3518  ;;  %v3440_v10 = vld [vmem:[#allocation8 + $0x700] ss:$16 sps:$4 sm:$0xff]  }
 0x275   :  { %2214 = vmatpush1.bf16.msra.mxu1 %v3386_v6  ;;  %2257 = vmatpush1.bf16.msra.mxu0 %v3389_v7  ;;  %v3521_v25 = vpop.eup %3520  ;;  %v1294_v26 = vadd.f32 1.0, %v3519_v17  ;;  %v3451_v17 = vld [vmem:[#allocation11 + $0x64] ss:$8 sps:$4 sm:$0xff]  }
 0x276   :  { %3524 = vrcp.f32 %v1271_v11  ;;  %2215 = vmatprep.subr.bf16.mxu1 %v3394_v8  ;;  %2258 = vmatprep.subr.bf16.mxu0 %v3397_v9  ;;  %v1295_v40 = vadd.f32 1.0, %v3521_v25  ;;  %v3443_v11 = vld [vmem:[#allocation8 + $0x708] ss:$16 sps:$4 sm:$0xff]  }
 0x277   :  { %3526 = vrcp.f32 %v1294_v26  ;;  %v3458_v25 = vld [vmem:[#allocation11 + $0x30] ss:$8 sps:$4 sm:$0xff]   ;;  %v3461_v26 = vld [vmem:[#allocation11 + $0x20] ss:$8 sps:$4 sm:$0xff]  }
 0x278   :  { %3528 = vrcp.f32 %v1295_v40 }
 0x279   :  { %2216 = vmatpush1.bf16.msra.mxu1 %v3392_v12  ;;  %2259 = vmatpush1.bf16.msra.mxu0 %v3395_v13 }
 0x27a   :  { %2217 = vmatprep.subr.bf16.mxu1 %v3400_v14  ;;  %2260 = vmatprep.subr.bf16.mxu0 %v3403_v15 }
 0x27d   :  { %2218 = vmatpush2.bf16.msra.mxu1 %v3398_v18  ;;  %2261 = vmatpush2.bf16.msra.mxu0 %v3401_v19  ;;  %v3449_v18 = vld [vmem:[#allocation11 + $0x60] ss:$8 sps:$4 sm:$0xff]   ;;  %v3452_v19 = vld [vmem:[#allocation11 + $0x50] ss:$8 sps:$4 sm:$0xff]  }
 0x27e   :  { %2219 = vmatprep.subr.bf16.mxu1 %v3406_v20  ;;  %2262 = vmatprep.subr.bf16.mxu0 %v3409_v23  ;;  %v3455_v20 = vld [vmem:[#allocation11 + $0x40] ss:$8 sps:$4 sm:$0xff]   ;;  %v3457_v23 = vld [vmem:[#allocation11 + $0x44] ss:$8 sps:$4 sm:$0xff]  }
 0x27f   :  { %v3523_v35 = vpop.eup %3522 }
 0x280   :  { %v1306_v21 = vmul.f32 %v3523_v35, %v1249_v24  ;;  %v3460_v24 = vld [vmem:[#allocation11 + $0x34] ss:$8 sps:$4 sm:$0xff]   ;;  %v3470_v35 = vld [vmem:[#allocation14 + $0x70] ss:$8 sps:$4 sm:$0xff]  }
 0x281   :  { %2220 = vmatpush2.bf16.msra.mxu1 %v3404_v27  ;;  %2263 = vmatpush2.bf16.msra.mxu0 %v3407_v28  ;;  %v3466_v27 = vld [vmem:[#allocation11 + $0x14] ss:$8 sps:$4 sm:$0xff]   ;;  %v3464_v28 = vld [vmem:[#allocation11 + $0x10] ss:$8 sps:$4 sm:$0xff]  }
 0x282   :  { %v1310_v42 = vadd.f32 %v1306_v21, %v1247_v16  ;;  %2221 = vmatprep.subr.bf16.mxu1 %v3412_v31  ;;  %2264 = vmatprep.subr.bf16.mxu0 %v3415_v32  ;;  %v3446_v16 = vld [vmem:[#allocation11 + $0x70] ss:$8 sps:$4 sm:$0xff]   ;;  %v3469_v31 = vld [vmem:[#allocation11 + $0x4] ss:$8 sps:$4 sm:$0xff]   ;;  %v3467_v32 = vld [vmem:[#allocation11] ss:$8 sps:$4 sm:$0xff]  }
 0x283   :  { %v3525_v45 = vpop.eup %3524  ;;  %v3475_v21 = vld [vmem:[#allocation14 + $0x64] ss:$8 sps:$4 sm:$0xff]  }
 0x284   :  { %3530 = vtanh.f32 %v1310_v42  ;;  %v1307_v47 = vmul.f32 %v3525_v45, %v1253_v46  ;;  %v3527_v57 = vpop.eup %3526  ;;  %v3473_v42 = vld [vmem:[#allocation14 + $0x60] ss:$8 sps:$4 sm:$0xff]   ;;  %v3476_v46 = vld [vmem:[#allocation14 + $0x50] ss:$8 sps:$4 sm:$0xff]  }
 0x285   :  { %2222 = vmatpush2.bf16.msra.mxu1 %v3410_v22  ;;  %2265 = vmatpush2.bf16.msra.mxu0 %v3413_v41  ;;  %v3529_v61 = vpop.eup %3528  ;;  %v1318_v62 = vsub.f32 1.0, %v3527_v57  ;;  %v1326_v6 = vmul.f32 %v3527_v57, %v3928_v33  ;;  %v3448_v33 = vld [vmem:[#allocation11 + $0x74] ss:$8 sps:$4 sm:$0xff]  }
 0x286   :  { %v1311_v50 = vadd.f32 %v1307_v47, %v1251_v36  ;;  %2223 = vmatprep.subr.bf16.mxu1 %v3418_v43  ;;  %2266 = vmatprep.subr.bf16.mxu0 %v3421_v44  ;;  %v1319_v7 = vsub.f32 1.0, %v3529_v61  ;;  %v1327_v13 = vmul.f32 %v3529_v61, %v3930_v34  ;;  %v3454_v34 = vld [vmem:[#allocation11 + $0x54] ss:$8 sps:$4 sm:$0xff]   ;;  %v3472_v36 = vld [vmem:[#allocation14 + $0x74] ss:$8 sps:$4 sm:$0xff]  }
 0x287   :  { %v3478_v43 = vld [vmem:[#allocation14 + $0x54] ss:$8 sps:$4 sm:$0xff]   ;;  %v3481_v47 = vld [vmem:[#allocation14 + $0x44] ss:$8 sps:$4 sm:$0xff]  }
 0x288   :  { %3532 = vtanh.f32 %v1311_v50  ;;  %v3479_v50 = vld [vmem:[#allocation14 + $0x40] ss:$8 sps:$4 sm:$0xff]  }
 0x289   :  { %2224 = vmatpush2.bf16.msra.mxu1 %v3416_v48  ;;  %2267 = vmatpush2.bf16.msra.mxu0 %v3419_v49 }
 0x28a   :  { %2225 = vmatprep.subr.bf16.mxu1 %v3424_v51  ;;  %2268 = vmatprep.subr.bf16.mxu0 %v3427_v52  ;;  %v3484_v51 = vld [vmem:[#allocation14 + $0x34] ss:$8 sps:$4 sm:$0xff]  }
 0x28d   :  { %2226 = vmatpush2.bf16.msra.mxu1 %v3422_v53  ;;  %2269 = vmatpush2.bf16.msra.mxu0 %v3425_v54  ;;  %v3482_v53 = vld [vmem:[#allocation14 + $0x30] ss:$8 sps:$4 sm:$0xff]  }
 0x28e   :  { %2227 = vmatprep.subr.bf16.mxu1 %v3430_v55  ;;  %2270 = vmatprep.subr.bf16.mxu0 %v3433_v56 }
 0x291   :  { %v3531_v63 = vpop.eup %3530  ;;  %2228 = vmatpush2.bf16.msra.mxu1 %v3428_v39  ;;  %2271 = vmatpush2.bf16.msra.mxu0 %v3431_v58 }
 0x292   :  { %2229 = vmatprep.subr.bf16.mxu1 %v3436_v59  ;;  %2272 = vmatprep.subr.bf16.mxu0 %v3439_v60  ;;  %v1322_v5 = vmul.f32 %v3531_v63, %v1318_v62 }
 0x294   :  { %v1330_v8 = vadd.f32 %v1326_v6, %v1322_v5 }
 0x295   :  { %v3533_v9 = vpop.eup %3532  ;;  %2230 = vmatpush2.bf16.msra.mxu1 %v3434_v0  ;;  %2273 = vmatpush2.bf16.msra.mxu0 %v3437_v1 }
 0x296   :  { %2231 = vmatprep.subr.bf16.mxu1 %v3442_v3  ;;  %2274 = vmatprep.subr.bf16.mxu0 %v3445_v4  ;;  %v1323_v12 = vmul.f32 %v3533_v9, %v1319_v7  ;;  %1334 = vst [vmem:[#allocation19 + $0x10] sm:$0xff] %v1330_v8 }
 0x298   :  { %v1331_v14 = vadd.f32 %v1327_v13, %v1323_v12 }
 0x299   :  { %2232 = vmatpush2.bf16.msra.mxu1 %v3440_v10  ;;  %2275 = vmatpush2.bf16.msra.mxu0 %v3443_v11 }
 0x29a   :  { %1335 = vst [vmem:[#allocation19 + $0x18] sm:$0xff] %v1331_v14  ;;  %v1879_v15 = vpack.c.bf16 %v1331_v14, %v1330_v8  ;;  %2467 = vmatprep.subr.bf16.mxu1 %v3448_v33  ;;  %2616 = vmatprep.subr.bf16.mxu0 %v3472_v36 }
 0x29c   :  { %2234 = vmatmul.mubr.bf16.vlgmr.msra.gmra.mxu1 %v1879_v15  ;;  %2277 = vmatmul.mubr.bf16.vlgmr.msra.gmra.mxu0 %v1879_v15 }
 0x29d   :  { %2499 = vmatprep.mubr.bf16.mxu1 %v3815_v2  ;;  %2648 = vmatprep.mubr.bf16.mxu0 %v3815_v2  ;;  %v3463_v2 = vld [vmem:[#allocation11 + $0x24] ss:$8 sps:$4 sm:$0xff]  }
 0x29e   :  { %2468 = vmatpush1.bf16.msra.mxu1 %v3446_v16  ;;  %2617 = vmatpush1.bf16.msra.mxu0 %v3470_v35 }
 0x29f   :  { %2469 = vmatprep.subr.bf16.mxu1 %v3451_v17  ;;  %2618 = vmatprep.subr.bf16.mxu0 %v3475_v21 }
 0x2a2   :  { %2470 = vmatpush1.bf16.msra.mxu1 %v3449_v18  ;;  %2619 = vmatpush1.bf16.msra.mxu0 %v3473_v42 }
 0x2a3   :  { %2471 = vmatprep.subr.bf16.mxu1 %v3454_v34  ;;  %2620 = vmatprep.subr.bf16.mxu0 %v3478_v43 }
 0x2a6   :  { %2472 = vmatpush1.bf16.msra.mxu1 %v3452_v19  ;;  %2621 = vmatpush1.bf16.msra.mxu0 %v3476_v46 }
 0x2a7   :  { %2473 = vmatprep.subr.bf16.mxu1 %v3457_v23  ;;  %2622 = vmatprep.subr.bf16.mxu0 %v3481_v47 }
 0x2aa   :  { %2474 = vmatpush1.bf16.msra.mxu1 %v3455_v20  ;;  %2623 = vmatpush1.bf16.msra.mxu0 %v3479_v50 }
 0x2ab   :  { %2475 = vmatprep.subr.bf16.mxu1 %v3460_v24  ;;  %2624 = vmatprep.subr.bf16.mxu0 %v3484_v51 }
 0x2ae   :  { %2476 = vmatpush1.bf16.msra.mxu1 %v3458_v25  ;;  %2625 = vmatpush1.bf16.msra.mxu0 %v3482_v53 }
 0x2af   :  { %2477 = vmatprep.subr.bf16.mxu1 %v3463_v2 }
 0x2b2   :  { %2478 = vmatpush1.bf16.msra.mxu1 %v3461_v26 }
 0x2b3   :  { %2479 = vmatprep.subr.bf16.mxu1 %v3466_v27 }
 0x2b6   :  { %2480 = vmatpush1.bf16.msra.mxu1 %v3464_v28 }
 0x2b7   :  { %2481 = vmatprep.subr.bf16.mxu1 %v3469_v31 }
 0x2ba   :  { %2482 = vmatpush1.bf16.msra.mxu1 %v3467_v32 }
 0x31c   :  { %v1762_v40 = vpop.f32.mrf.mxu1  ;;  %v1805_v39 = vpop.f32.mrf.mxu0 }
 0x31d   :  { %v2982_v22 = vmul.f32 -1.442695, %v1762_v40 }
 0x31e   :  { %v1764_v41 = vpop.f32.mrf.mxu1  ;;  %v1807_v59 = vpop.f32.mrf.mxu0 }
 0x31f   :  { %3534 = vpow2.f32 %v2982_v22  ;;  %v2986_v48 = vmul.f32 -1.442695, %v1764_v41 }
 0x320   :  { %v1766_v44 = vpop.f32.mrf.mxu1  ;;  %v1809_v63 = vpop.f32.mrf.mxu0 }
 0x321   :  { %v2983_v45 = vmul.f32 -1.442695, %v1766_v44 }
 0x322   :  { %v1768_v49 = vpop.f32.mrf.mxu1  ;;  %v1811_v5 = vpop.f32.mrf.mxu0 }
 0x323   :  { %3536 = vpow2.f32 %v2983_v45  ;;  %v2987_v52 = vmul.f32 -1.442695, %v1768_v49 }
 0x324   :  { %3538 = vpow2.f32 %v2986_v48 }
 0x325   :  { %3540 = vpow2.f32 %v2987_v52 }
 0x32c   :  { %v3535_v54 = vpop.eup %3534 }
 0x32d   :  { %v2299_v55 = vadd.f32 1.0, %v3535_v54 }
 0x32f   :  { %3542 = vrcp.f32 %v2299_v55 }
 0x330   :  { %v3537_v56 = vpop.eup %3536 }
 0x331   :  { %v2300_v57 = vadd.f32 1.0, %v3537_v56  ;;  %v3539_v58 = vpop.eup %3538 }
 0x332   :  { %v3541_v60 = vpop.eup %3540  ;;  %v2323_v61 = vadd.f32 1.0, %v3539_v58 }
 0x333   :  { %3544 = vrcp.f32 %v2300_v57  ;;  %v2324_v0 = vadd.f32 1.0, %v3541_v60 }
 0x334   :  { %3546 = vrcp.f32 %v2323_v61 }
 0x335   :  { %3548 = vrcp.f32 %v2324_v0  ;;  %v3490_v0 = vld [vmem:[#allocation14 + $0x14] ss:$8 sps:$4 sm:$0xff]  }
 0x33c   :  { %v3543_v62 = vpop.eup %3542 }
 0x33d   :  { %v2335_v1 = vmul.f32 %v3543_v62, %v1807_v59  ;;  %v3487_v62 = vld [vmem:[#allocation14 + $0x24] ss:$8 sps:$4 sm:$0xff]  }
 0x33e   :  { %2626 = vmatprep.subr.bf16.mxu0 %v3487_v62 }
 0x33f   :  { %v2339_v3 = vadd.f32 %v2335_v1, %v1805_v39  ;;  %v3488_v1 = vld [vmem:[#allocation14 + $0x10] ss:$8 sps:$4 sm:$0xff]  }
 0x340   :  { %v3545_v4 = vpop.eup %3544 }
 0x341   :  { %3550 = vtanh.f32 %v2339_v3  ;;  %v2336_v6 = vmul.f32 %v3545_v4, %v1811_v5  ;;  %v3547_v8 = vpop.eup %3546  ;;  %v3491_v3 = vld [vmem:[#allocation14] ss:$8 sps:$4 sm:$0xff]   ;;  %v2508_v4 = vld [vmem:[#allocation12] sm:$0xff] }
 0x342   :  { %v3549_v9 = vpop.eup %3548  ;;  %v2347_v10 = vsub.f32 1.0, %v3547_v8  ;;  %v2355_v13 = vmul.f32 %v3547_v8, %v3940_v37 }
 0x343   :  { %v2340_v7 = vadd.f32 %v2336_v6, %v1809_v63  ;;  %v2348_v14 = vsub.f32 1.0, %v3549_v9  ;;  %v2356_v17 = vmul.f32 %v3549_v9, %v3942_v38  ;;  %v3485_v63 = vld [vmem:[#allocation14 + $0x20] ss:$8 sps:$4 sm:$0xff]   ;;  %v2509_v9 = vld [vmem:[#allocation12 + $0x8] sm:$0xff] }
 0x344   :  { %2627 = vmatpush1.bf16.msra.mxu0 %v3485_v63 }
 0x345   :  { %3552 = vtanh.f32 %v2340_v7  ;;  %2628 = vmatprep.subr.bf16.mxu0 %v3490_v0  ;;  %v2514_v7 = vstv %s2701_s14 }
 0x348   :  { %2629 = vmatpush1.bf16.msra.mxu0 %v3488_v1 }
 0x34e   :  { %v3551_v11 = vpop.eup %3550 }
 0x34f   :  { %v2351_v12 = vmul.f32 %v3551_v11, %v2347_v10 }
 0x351   :  { %v2359_v15 = vadd.f32 %v2355_v13, %v2351_v12 }
 0x352   :  { %v3553_v33 = vpop.eup %3552 }
 0x353   :  { %v2352_v16 = vmul.f32 %v3553_v33, %v2348_v14  ;;  %2364 = vst [vmem:[#allocation19 + $0x20] sm:$0xff] %v2359_v15 }
 0x355   :  { %v2360_v18 = vadd.f32 %v2356_v17, %v2352_v16 }
 0x357   :  { %2365 = vst [vmem:[#allocation19 + $0x28] sm:$0xff] %v2360_v18 }
 0x35c   :  { %v2235_v34 = vpop.f32.mrf.mxu1  ;;  %v2278_v31 = vpop.f32.mrf.mxu0 }
 0x35d   :  { %v2984_v19 = vmul.f32 -1.442695, %v2235_v34 }
 0x35e   :  { %v2237_v20 = vpop.f32.mrf.mxu1  ;;  %v2280_v35 = vpop.f32.mrf.mxu0 }
 0x35f   :  { %3554 = vpow2.f32 %v2984_v19  ;;  %v2988_v25 = vmul.f32 -1.442695, %v2237_v20 }
 0x360   :  { %v2239_v23 = vpop.f32.mrf.mxu1  ;;  %v2282_v22 = vpop.f32.mrf.mxu0 }
 0x361   :  { %v2985_v24 = vmul.f32 -1.442695, %v2239_v23 }
 0x362   :  { %v2241_v2 = vpop.f32.mrf.mxu1  ;;  %v2284_v45 = vpop.f32.mrf.mxu0 }
 0x363   :  { %3556 = vpow2.f32 %v2985_v24  ;;  %v2989_v26 = vmul.f32 -1.442695, %v2241_v2 }
 0x364   :  { %3558 = vpow2.f32 %v2988_v25 }
 0x365   :  { %3560 = vpow2.f32 %v2989_v26 }
 0x36c   :  { %v3555_v37 = vpop.eup %3554 }
 0x36d   :  { %v2301_v27 = vadd.f32 1.0, %v3555_v37 }
 0x36f   :  { %3562 = vrcp.f32 %v2301_v27 }
 0x370   :  { %v3557_v28 = vpop.eup %3556 }
 0x371   :  { %v2302_v38 = vadd.f32 1.0, %v3557_v28  ;;  %v3559_v32 = vpop.eup %3558 }
 0x372   :  { %v3561_v36 = vpop.eup %3560  ;;  %v2325_v40 = vadd.f32 1.0, %v3559_v32 }
 0x373   :  { %3564 = vrcp.f32 %v2302_v38  ;;  %v2326_v41 = vadd.f32 1.0, %v3561_v36 }
 0x374   :  { %3566 = vrcp.f32 %v2325_v40 }
 0x375   :  { %3568 = vrcp.f32 %v2326_v41 }
 0x37c   :  { %v3563_v21 = vpop.eup %3562 }
 0x37d   :  { %v2337_v42 = vmul.f32 %v3563_v21, %v2280_v35 }
 0x37f   :  { %v2341_v43 = vadd.f32 %v2337_v42, %v2278_v31 }
 0x380   :  { %v3565_v44 = vpop.eup %3564 }
 0x381   :  { %3570 = vtanh.f32 %v2341_v43  ;;  %v2338_v46 = vmul.f32 %v3565_v44, %v2284_v45  ;;  %v3567_v48 = vpop.eup %3566 }
 0x382   :  { %v3569_v49 = vpop.eup %3568  ;;  %v2349_v50 = vsub.f32 1.0, %v3567_v48  ;;  %v2357_v53 = vmul.f32 %v3567_v48, %v3948_v29  ;;  %v3493_v29 = vld [vmem:[#allocation14 + $0x4] ss:$8 sps:$4 sm:$0xff]  }
 0x383   :  { %v2342_v47 = vadd.f32 %v2338_v46, %v2282_v22  ;;  %v2350_v54 = vsub.f32 1.0, %v3569_v49  ;;  %v2358_v39 = vmul.f32 %v3569_v49, %v3950_v30  ;;  %2630 = vmatprep.subr.bf16.mxu0 %v3493_v29 }
 0x384   :  { %2631 = vmatpush1.bf16.msra.mxu0 %v3491_v3 }
 0x385   :  { %3572 = vtanh.f32 %v2342_v47 }
 0x38e   :  { %v3571_v51 = vpop.eup %3570 }
 0x38f   :  { %v2353_v52 = vmul.f32 %v3571_v51, %v2349_v50 }
 0x391   :  { %v2361_v55 = vadd.f32 %v2357_v53, %v2353_v52 }
 0x392   :  { %v3573_v56 = vpop.eup %3572 }
 0x393   :  { %v2354_v57 = vmul.f32 %v3573_v56, %v2350_v54  ;;  %2366 = vst [vmem:[#allocation19 + $0x30] sm:$0xff] %v2361_v55  ;;  %v2369_v60 = vadd.f32 %v2361_v55, %v2360_v18 }
 0x395   :  { %v2362_v58 = vadd.f32 %v2358_v39, %v2354_v57 }
 0x397   :  { %2367 = vst [vmem:[#allocation19 + $0x38] sm:$0xff] %v2362_v58  ;;  %v2368_v59 = vsub.f32 %v2359_v15, %v2362_v58 }
 0x399   :  { %v2386_v61 = vpack.c.bf16 %v2369_v60, %v2368_v59 }
 0x39b   :  { %2500 = vmatmul.mubr.bf16.vlgmr.msra.gmra.mxu1 %v2386_v61 }
 0x45b   :  { %v2501_v30 = vpop.f32.mrf.mxu1 }
 0x45c   :  { %v2510_v6 = vadd.f32 %v2508_v4, %v2501_v30 }
 0x45d   :  { %v2503_v5 = vpop.f32.mrf.mxu1 }
 0x45e   :  { %v2515_v11 = vmul.f32 %v2514_v7, %v2510_v6  ;;  %vm2512_vm2 = vcmp.ge.f32.partialorder %v2510_v6, 0.0 }
 0x45f   :  { %v2504_v8 = vpop.f32.mrf.mxu1 }
 0x460   :  { %v2517_v14 = vsel %vm2512_vm2, %v2510_v6, %v2515_v11 }
 0x461   :  { %v2505_v10 = vpop.f32.mrf.mxu1 }
 0x462   :  { %v2511_v12 = vadd.f32 %v2509_v9, %v2505_v10 }
 0x464   :  { %vm2513_vm3 = vcmp.ge.f32.partialorder %v2511_v12, 0.0  ;;  %v2516_v13 = vmul.f32 %v2514_v7, %v2511_v12 }
 0x466   :  { %v2518_v15 = vsel %vm2513_vm3, %v2511_v12, %v2516_v13 }
 0x467   :  { %v2535_v33 = vpack.c.bf16 %v2518_v15, %v2517_v14 }
 0x469   :  { %2649 = vmatmul.mubr.bf16.vlgmr.msra.gmra.mxu0 %v2535_v33 }
 0x46a   :  { %3757 = shalt.err (!%p3754_p7)
}
 0x46b   :  { %2686 = dma.vmem_to_hbm [thread:$0]  %s2681_s5, 1024, %s3984_s10, [#allocation20], %s3804_s18, %s3804_s18, %s3805_s19   ;;  %v2657_v16 = vld [vmem:[#allocation15] sm:$0xff]  ;;  %v2658_v20 = vld [vmem:[#allocation15 + $0x8] sm:$0xff] }
 0x46c   :  { %s3817_s21 = smov [#allocation18]  }
 0x46d   :  { %s2668_s22 = sshll.u32 %s3817_s21, 4  ;;  %s2669_s22 = int_to_ptr.vmem [resolvable:$true] %s2668_s22 }
 0x46e   :  { %s3766_s0 = scalar_lea.vmem %s2669_s22, 256  ;;  %p3771_p9 = scmp.lt.s32.totalorder %s2669_s22, %s2669_s22 }
 0x46f   :  { %p3767_p8 = scmp.ne.s32.totalorder %s2669_s22, %s3766_s0  ;;  %p3772_p10 = scmp.lt.s32.totalorder %s3766_s0, %s3766_s0 }
 0x471   :  { %p3773_p11 = por %p3772_p10, %p3771_p9 }
 0x473   :  { %p3774_p12 = pnand %p3773_p11, %p3767_p8 }
 0x529   :  { %v2650_v17 = vpop.f32.mrf.mxu0 }
 0x52a   :  { %v2659_v18 = vadd.f32 %v2657_v16, %v2650_v17 }
 0x52b   :  { %v2652_v34 = vpop.f32.mrf.mxu0 }
 0x52c   :  { %2661 = vst [vmem:[#allocation18] sm:$0xff] %v2659_v18 }
 0x52d   :  { %v2653_v19 = vpop.f32.mrf.mxu0 }
 0x52f   :  { %v2654_v23 = vpop.f32.mrf.mxu0 }
 0x530   :  { %v2660_v24 = vadd.f32 %v2658_v20, %v2654_v23 }
 0x532   :  { %2662 = vst [vmem:[#allocation18 + $0x8] sm:$0xff] %v2660_v24 }
 0x533   :  { %3777 = shalt.err (!%p3774_p12)
}
 0x534   :  { %2674 = dma.vmem_to_hbm [thread:$0]  %s2669_s22, 256, %s3983_s9, [#allocation4], %s3804_s18, %s3804_s18, %s3805_s19  }
 0x535   :  { %3798 = dma.done.wait [#allocation4], 256  }
 0x536   :  { %3799 = vsyncadd [#allocation4], 4294967040 }
 0x537   :  { %3800 = dma.done.wait [#allocation20], 1024  }
 0x538   :  { %3801 = vsyncadd [#allocation20], 4294966272 }
 0x539   :  { %2693 = vsyncpa [#allocation3], 1 }
 0x53a   :  { %2694 = vsyncpa [#allocation7], 1 }
 0x53b   :  { %2695 = vsyncpa [#allocation10], 1 }
 0x53c   :  { %2696 = vsyncpa [#allocation13], 1 }
 0x53d   :  { %2697 = vsyncpa [#allocation16], 1 }
 0x53e   :  { %2698 = vsyncpa [#allocation4], 1 }
 0x53f   :  { %2699 = vsyncpa [#allocation20], 1 }
 0x540   :  { %2700 = vsyncpa [#allocation5], 1 }

</bundles_post_ra>
